<compile_context>
chip_gen: v6e
topology: v6e:2x2x1
jax: 0.10.0
libtpu: 0.0.40
codegen_flags: <defaults>
</compile_context>

<pallas_src>
import functools

import jax
import jax.numpy as jnp
import numpy as np
from jax.experimental import pallas as pl
from jax.experimental.pallas import tpu as pltpu


def _garan_kernel(q_ref, v_ref,
                  wqt2_ref, bq2_ref, qmask_ref,
                  wkckd_ref, bkckd_ref, wvs_ref, bvs_ref,
                  ecol_ref, edif_ref, perm_ref,
                  wo_ref, bo_ref, wmwo_ref, wmbo_ref, tapok_ref,
                  bns_ref, bnb_ref,
                  out_ref, mattn_ref, attn_ref,
                  *, n_head, d_h, H, W, temperature, batch_block):
    f32 = jnp.float32
    HW = H * W
    inv_t = 1.0 / temperature

    # Hoisted iota constants, shared by all batch elements in this block.
    branch_row = jax.lax.broadcasted_iota(jnp.int32, (2 * n_head, HW), 0)
    is_collect = branch_row < n_head                       # rows 0..n-1 collect
    tap_row = jax.lax.broadcasted_iota(jnp.int32, (9, HW), 0)
    tap_ok = tapok_ref[...].astype(f32)                    # (9, HW) validity

    for bb in range(batch_block):
        v_flat = v_ref[bb].astype(f32)                     # (d_v, HW)

        # ---- kc / kd 1x1 convs fused into one MXU matmul ---------------------
        kckd = (jnp.dot(wkckd_ref[...].astype(f32), v_flat,
                        preferred_element_type=f32)
                + bkckd_ref[...].astype(f32))              # (2*d_o, HW)

        # ---- q linear projection (columns pre-duplicated for the kc|kd halves)
        qp2 = (jnp.dot(q_ref[bb].astype(f32), wqt2_ref[...].astype(f32),
                       preferred_element_type=f32)
               + bq2_ref[...].astype(f32))                 # (1, 2*d_o)

        # ---- ALL collect + diffuse logits with one block-diagonal matmul ----
        q_bd = qmask_ref[...].astype(f32) * qp2            # (2n, 2*d_o)
        logits = jnp.dot(q_bd, kckd,
                         preferred_element_type=f32) * inv_t  # (2n, HW)

        # Per-row softmax (collect rows) and stable sigmoid (diffuse rows),
        # computed on every row and merged with a row-id select — no sublane
        # slicing of values.  exp / rcp land on the otherwise idle EUP.
        mx = jnp.max(logits, axis=1, keepdims=True)
        e = jnp.exp(logits - mx)
        soft = e * pl.reciprocal(jnp.sum(e, axis=1, keepdims=True), approx=True)
        ez = jnp.exp(-jnp.abs(logits))
        r = pl.reciprocal(1.0 + ez, approx=True)
        sig = jnp.where(logits >= 0.0, r, 1.0 - r)
        combined = jnp.where(is_collect, soft, sig)        # (2n, HW)

        # Spatial permutation absorbing the reference's
        # permute(0,1,4,3,2).view(B,-1,H,W) relayout (exact for any H, W).
        combined_perm = jnp.dot(combined, perm_ref[...].astype(f32),
                                preferred_element_type=f32)  # (2n, HW)

        # ---- v 1x1 conv + collect-branch reduction (vectorized over heads) --
        vv = (jnp.dot(wvs_ref[...].astype(f32), v_flat,
                      preferred_element_type=f32)
              + bvs_ref[...].astype(f32))                  # (d_o, HW)
        w_exp = jnp.dot(ecol_ref[...].astype(f32), combined,
                        preferred_element_type=f32)        # (d_o, HW)
        a_col = jnp.sum(vv * w_exp, axis=1, keepdims=True)  # (d_o, 1)

        # Diffuse factor expanded per channel, already in the final layout.
        dif_exp = jnp.dot(edif_ref[...].astype(f32), combined_perm,
                          preferred_element_type=f32)      # (d_o, HW)
        attn_in = a_col * dif_exp                          # (d_o, HW)

        # ---- w_o 1x1 conv ----------------------------------------------------
        attn_map = (jnp.dot(wo_ref[...].astype(f32), attn_in,
                            preferred_element_type=f32)
                    + bo_ref[...].astype(f32))             # (d_o, HW)
        attn_ref[bb] = attn_map.astype(attn_ref.dtype)

        # ---- w_m 3x3 conv (pre-folded through w_o): one matmul for the 9 tap
        #      projections, then 8 pltpu.roll lane shifts + mask + sublane sum.
        proj = (jnp.dot(wmwo_ref[...].astype(f32), attn_in,
                        preferred_element_type=f32)
                + wmbo_ref[...].astype(f32))               # (9, HW)
        acc = None
        for k in range(9):
            off = (k // 3 - 1) * W + (k % 3 - 1)           # flattened tap offset
            rolled = proj if off == 0 else pltpu.roll(proj, shift=(-off) % HW,
                                                      axis=1)
            sel = jnp.where(tap_row == k, rolled, 0.0)     # keep only row k
            acc = sel if acc is None else acc + sel
        m = jnp.sum(tap_ok * acc, axis=0, keepdims=True)   # (1, HW)
        mattn_ref[bb] = m.astype(mattn_ref.dtype)

        # ---- BatchNorm2d (inference) + residual + LeakyReLU(0.1) -------------
        y = (attn_map * bns_ref[...].astype(f32) + bnb_ref[...].astype(f32)
             + v_ref[bb].astype(f32))
        out_ref[bb] = jnp.where(y >= 0.0, y, 0.1 * y).astype(out_ref.dtype)


def garan_attention_forward(q, v, params, n_head, *, batch_block=1):
    """GaranAttention forward (inference mode) as one fused Pallas TPU kernel.

    Returns (output, m_attn, attn) exactly like the PyTorch module.
    batch_block = elements processed per grid step (1 -> one step per batch
    element, good for v7x's two TensorCores; B -> single fat step, good for
    single-TC v5e/v6e).
    """
    B, d_q = q.shape
    _, d_v, H, W = v.shape
    d_o = params["w_o_w"].shape[0]
    d_h = d_o // n_head
    HW = H * W
    assert B % batch_block == 0
    hp = jax.lax.Precision.HIGHEST

    # ---- wrapper-side weight packing (layout plumbing, done once) ------------
    wqt = params["w_qs_w"].T                                       # (d_q, d_o)
    wqt2 = jnp.concatenate([wqt, wqt], axis=1)                     # (d_q, 2*d_o)
    bq2 = jnp.concatenate([params["w_qs_b"],
                           params["w_qs_b"]]).reshape(1, 2 * d_o)

    wkckd = jnp.concatenate([params["w_kc_w"].reshape(d_o, d_v),
                             params["w_kd_w"].reshape(d_o, d_v)],
                            axis=0)                                # (2*d_o, d_v)
    bkckd = jnp.concatenate([params["w_kc_b"],
                             params["w_kd_b"]]).reshape(2 * d_o, 1)
    wvs = params["w_vs_w"].reshape(d_o, d_v)
    bvs = params["w_vs_b"].reshape(d_o, 1)
    wo = params["w_o_w"].reshape(d_o, d_o)
    bo = params["w_o_b"].reshape(d_o, 1)

    # Fold the 3x3 w_m conv through w_o so the 9 tap projections read attn_in.
    wm9 = jnp.transpose(params["w_m_w"][0], (1, 2, 0)).reshape(9, d_o)
    wmwo = jnp.dot(wm9, wo, precision=hp)                          # (9, d_o)
    wmbo = jnp.dot(wm9, bo, precision=hp)                          # (9, 1)
    # The conv's own bias is added exactly once per pixel: fold it into the
    # always-valid center tap (k=4, zero offset).
    wmbo = wmbo.at[4, 0].add(params["w_m_b"][0])

    bn_scale = (params["bn_gamma"] /
                jnp.sqrt(params["bn_var"] + 1e-5)).reshape(d_o, 1)
    bn_bias = (params["bn_beta"].reshape(d_o, 1)
               - params["bn_mean"].reshape(d_o, 1) * bn_scale)

    # Block-diagonal q selection mask: row r picks channel block r of [kc|kd].
    q_mask = jnp.asarray(
        (np.arange(2 * d_o)[None, :] // d_h ==
         np.arange(2 * n_head)[:, None]).astype(np.float32))       # (2n, 2*d_o)

    # One-hot head->channel expanders over the fused (2n) collect/diffuse rows.
    heads = np.arange(d_o) // d_h
    e_col_np = np.zeros((d_o, 2 * n_head), np.float32)
    e_dif_np = np.zeros((d_o, 2 * n_head), np.float32)
    e_col_np[np.arange(d_o), heads] = 1.0
    e_dif_np[np.arange(d_o), n_head + heads] = 1.0
    e_col = jnp.asarray(e_col_np)
    e_dif = jnp.asarray(e_dif_np)

    # Spatial permutation matrix: dst flat index p -> src (p % H) * W + p // H.
    dst = np.arange(HW)
    src = (dst % H) * W + (dst // H)
    perm_np = np.zeros((HW, HW), np.float32)
    perm_np[src, dst] = 1.0
    perm = jnp.asarray(perm_np)

    # 3x3 tap validity mask (9, HW): 1 where the (dy,dx) tap stays in-image.
    rows = np.arange(H)[:, None]
    cols = np.arange(W)[None, :]
    tap_list = []
    for dy in (-1, 0, 1):
        for dx in (-1, 0, 1):
            ok = ((rows + dy >= 0) & (rows + dy < H) &
                  (cols + dx >= 0) & (cols + dx < W))
            tap_list.append(ok.reshape(-1))
    tap_ok = jnp.asarray(np.stack(tap_list, axis=0).astype(np.float32))

    q3 = q.reshape(B, 1, d_q)
    v_flat = v.reshape(B, d_v, HW)        # v shipped exactly once, no transpose

    kernel = functools.partial(
        _garan_kernel, n_head=n_head, d_h=d_h, H=H, W=W,
        temperature=float(np.power(d_h, 0.5)), batch_block=batch_block)

    def weight_spec(arr):
        nd = arr.ndim

        def idx(b):
            return (0,) * nd
        return pl.BlockSpec(arr.shape, idx)

    def batch_spec(trailing):
        nz = len(trailing)

        def idx(b):
            return (b,) + (0,) * nz
        return pl.BlockSpec((batch_block,) + tuple(trailing), idx)

    grid = (B // batch_block,)

    out, m_attn, attn = pl.pallas_call(
        kernel,
        out_shape=(
            jax.ShapeDtypeStruct((B, d_o, HW), v.dtype),
            jax.ShapeDtypeStruct((B, 1, HW), v.dtype),
            jax.ShapeDtypeStruct((B, d_o, HW), v.dtype),
        ),
        grid_spec=pltpu.PrefetchScalarGridSpec(
            num_scalar_prefetch=0,
            grid=grid,
            in_specs=[
                batch_spec((1, d_q)),       # q
                batch_spec((d_v, HW)),      # v (original layout, single copy)
                weight_spec(wqt2), weight_spec(bq2), weight_spec(q_mask),
                weight_spec(wkckd), weight_spec(bkckd),
                weight_spec(wvs), weight_spec(bvs),
                weight_spec(e_col), weight_spec(e_dif), weight_spec(perm),
                weight_spec(wo), weight_spec(bo),
                weight_spec(wmwo), weight_spec(wmbo), weight_spec(tap_ok),
                weight_spec(bn_scale), weight_spec(bn_bias),
            ],
            out_specs=(
                batch_spec((d_o, HW)),      # output (BN + residual + LeakyReLU)
                batch_spec((1, HW)),        # m_attn (3x3 conv, 1 channel)
                batch_spec((d_o, HW)),      # attn   (w_o output, pre-BN)
            ),
        ),
        compiler_params=pltpu.CompilerParams(
            dimension_semantics=("parallel",)),
    )(q3, v_flat, wqt2, bq2, q_mask, wkckd, bkckd, wvs, bvs,
      e_col, e_dif, perm, wo, bo, wmwo, wmbo, tap_ok, bn_scale, bn_bias)

    return (out.reshape(B, d_o, H, W),
            m_attn.reshape(B, HW),
            attn.reshape(B, d_o, H, W))


def garan_reference(q, v, params, n_head):
    """Pure-JAX replica of the PyTorch forward (inference mode)."""
    hp = jax.lax.Precision.HIGHEST
    B, _ = q.shape
    _, d_v, H, W = v.shape
    d_o = params["w_o_w"].shape[0]
    d_h = d_o // n_head
    L = H * W
    temperature = float(np.power(d_h, 0.5))

    residual = v
    qp = jnp.dot(q, params["w_qs_w"].T, precision=hp) + params["w_qs_b"]

    def conv1x1(x, w, b):
        return (jnp.einsum("oc,bchw->bohw", w.reshape(d_o, -1), x, precision=hp)
                + b.reshape(1, -1, 1, 1))

    kc = conv1x1(v, params["w_kc_w"], params["w_kc_b"]).reshape(B, n_head, d_h, L)
    kd = conv1x1(v, params["w_kd_w"], params["w_kd_b"]).reshape(B, n_head, d_h, L)
    vv = conv1x1(v, params["w_vs_w"], params["w_vs_b"]).reshape(B, n_head, d_h, L)

    q3 = qp.reshape(B * n_head, 1, d_h)
    kc3 = jnp.transpose(kc, (0, 1, 3, 2)).reshape(B * n_head, L, d_h)
    kd3 = jnp.transpose(kd, (0, 1, 3, 2)).reshape(B * n_head, L, d_h)
    vv3 = jnp.transpose(vv, (0, 1, 3, 2)).reshape(B * n_head, L, d_h)

    attn_col = jnp.einsum("bqd,bld->bql", q3, kc3, precision=hp) / temperature
    attn_col = jax.nn.softmax(attn_col, axis=2)
    attn_vec = jnp.einsum("bql,bld->bqd", attn_col, vv3, precision=hp)

    attn_dif = jnp.einsum("bld,bqd->blq", kd3, q3, precision=hp) / temperature
    attn_dif = jax.nn.sigmoid(attn_dif)

    output = jnp.einsum("blq,bqd->bld", attn_dif, attn_vec, precision=hp)
    output = output.reshape(B, n_head, H, W, d_h)
    output = jnp.transpose(output, (0, 1, 4, 3, 2)).reshape(B, n_head * d_h, H, W)

    output = conv1x1(output, params["w_o_w"], params["w_o_b"])
    attn_out = output

    m = jax.lax.conv_general_dilated(
        output, params["w_m_w"], (1, 1), ((1, 1), (1, 1)),
        dimension_numbers=("NCHW", "OIHW", "NCHW"), precision=hp)
    m_attn = (m + params["w_m_b"].reshape(1, 1, 1, 1)).reshape(B, L)

    scale = params["bn_gamma"] / jnp.sqrt(params["bn_var"] + 1e-5)
    bias = params["bn_beta"] - params["bn_mean"] * scale
    out = output * scale.reshape(1, -1, 1, 1) + bias.reshape(1, -1, 1, 1) + residual
    out = jnp.where(out >= 0.0, out, 0.1 * out)
    return out, m_attn, attn_out


if __name__ == "__main__":
    key = jax.random.PRNGKey(0)
    B, d_q, d_v, H, W = 2, 32, 32, 16, 16
    n_head = 2
    d_o = d_v

    ks = jax.random.split(key, 20)

    def nrm(k, shape, s=1.0):
        return jax.random.normal(k, shape, dtype=jnp.float32) * s

    params = {
        "w_qs_w": nrm(ks[0], (d_o, d_q), 1.0 / np.sqrt(d_q)),
        "w_qs_b": nrm(ks[1], (d_o,), 0.05),
        "w_kc_w": nrm(ks[2], (d_o, d_v, 1, 1), 1.0 / np.sqrt(d_v)),
        "w_kc_b": nrm(ks[3], (d_o,), 0.05),
        "w_kd_w": nrm(ks[4], (d_o, d_v, 1, 1), 1.0 / np.sqrt(d_v)),
        "w_kd_b": nrm(ks[5], (d_o,), 0.05),
        "w_vs_w": nrm(ks[6], (d_o, d_v, 1, 1), 1.0 / np.sqrt(d_v)),
        "w_vs_b": nrm(ks[7], (d_o,), 0.05),
        "w_o_w": nrm(ks[8], (d_o, d_o, 1, 1), 1.0 / np.sqrt(d_o)),
        "w_o_b": nrm(ks[9], (d_o,), 0.05),
        "w_m_w": nrm(ks[10], (1, d_o, 3, 3), 1.0 / np.sqrt(9 * d_o)),
        "w_m_b": nrm(ks[11], (1,), 0.05),
        "bn_gamma": 1.0 + 0.1 * jax.random.normal(ks[12], (d_o,), dtype=jnp.float32),
        "bn_beta": nrm(ks[13], (d_o,), 0.1),
        "bn_mean": nrm(ks[14], (d_o,), 0.1),
        "bn_var": jax.random.uniform(ks[15], (d_o,), dtype=jnp.float32,
                                     minval=0.5, maxval=1.5),
    }
    q = nrm(ks[16], (B, d_q))
    v = nrm(ks[17], (B, d_v, H, W))

    ref_out, ref_m, ref_attn = garan_reference(q, v, params, n_head)

    # batch_block=1: one element per step (v7x: steps split across the 2 TCs).
    # batch_block=B: single fat step (best for single-TC v5e/v6e).
    for bblk in (1, B):
        fwd = jax.jit(functools.partial(garan_attention_forward,
                                        n_head=n_head, batch_block=bblk))
        out, m_attn, attn = jax.block_until_ready(fwd(q, v, params))

        assert out.shape == (B, d_o, H, W), out.shape
        assert m_attn.shape == (B, H * W), m_attn.shape
        assert attn.shape == (B, d_o, H, W), attn.shape

        assert jnp.allclose(out, ref_out, atol=2e-3, rtol=2e-3), \
            f"output mismatch (batch_block={bblk})"
        assert jnp.allclose(m_attn, ref_m, atol=2e-3, rtol=2e-3), \
            f"m_attn mismatch (batch_block={bblk})"
        assert jnp.allclose(attn, ref_attn, atol=2e-3, rtol=2e-3), \
            f"attn mismatch (batch_block={bblk})"

    print("KERNEL_OK")
</pallas_src>

<mosaic_0001>
module attributes {stable_mosaic.version = 11 : i64} {
  func.func @_garan_kernel(%arg0: i32, %arg1: memref<1x1x32xf32, #tpu.memory_space<vmem>>, %arg2: memref<1x32x256xf32, #tpu.memory_space<vmem>>, %arg3: memref<32x64xf32, #tpu.memory_space<vmem>>, %arg4: memref<1x64xf32, #tpu.memory_space<vmem>>, %arg5: memref<4x64xf32, #tpu.memory_space<vmem>>, %arg6: memref<64x32xf32, #tpu.memory_space<vmem>>, %arg7: memref<64x1xf32, #tpu.memory_space<vmem>>, %arg8: memref<32x32xf32, #tpu.memory_space<vmem>>, %arg9: memref<32x1xf32, #tpu.memory_space<vmem>>, %arg10: memref<32x4xf32, #tpu.memory_space<vmem>>, %arg11: memref<32x4xf32, #tpu.memory_space<vmem>>, %arg12: memref<256x256xf32, #tpu.memory_space<vmem>>, %arg13: memref<32x32xf32, #tpu.memory_space<vmem>>, %arg14: memref<32x1xf32, #tpu.memory_space<vmem>>, %arg15: memref<9x32xf32, #tpu.memory_space<vmem>>, %arg16: memref<9x1xf32, #tpu.memory_space<vmem>>, %arg17: memref<9x256xf32, #tpu.memory_space<vmem>>, %arg18: memref<32x1xf32, #tpu.memory_space<vmem>>, %arg19: memref<32x1xf32, #tpu.memory_space<vmem>>, %arg20: memref<1x32x256xf32, #tpu.memory_space<vmem>>, %arg21: memref<1x1x256xf32, #tpu.memory_space<vmem>>, %arg22: memref<1x32x256xf32, #tpu.memory_space<vmem>>) attributes {dimension_semantics = [#tpu.dimension_semantics<parallel>], iteration_bounds = array<i64: 2>, scalar_prefetch = 0 : i64, scratch_operands = 0 : i64, tpu.core_type = #tpu.core_type<tc>, window_params = [{transform_indices = @transform_0, window_bounds = array<i64: 1, 1, 32>}, {transform_indices = @transform_1, window_bounds = array<i64: 1, 32, 256>}, {pipeline_mode = #tpu.pipeline_mode<synchronous>, transform_indices = @transform_2, window_bounds = array<i64: 32, 64>}, {pipeline_mode = #tpu.pipeline_mode<synchronous>, transform_indices = @transform_3, window_bounds = array<i64: 1, 64>}, {pipeline_mode = #tpu.pipeline_mode<synchronous>, transform_indices = @transform_4, window_bounds = array<i64: 4, 64>}, {pipeline_mode = #tpu.pipeline_mode<synchronous>, transform_indices = @transform_5, window_bounds = array<i64: 64, 32>}, {pipeline_mode = #tpu.pipeline_mode<synchronous>, transform_indices = @transform_6, window_bounds = array<i64: 64, 1>}, {pipeline_mode = #tpu.pipeline_mode<synchronous>, transform_indices = @transform_7, window_bounds = array<i64: 32, 32>}, {pipeline_mode = #tpu.pipeline_mode<synchronous>, transform_indices = @transform_8, window_bounds = array<i64: 32, 1>}, {pipeline_mode = #tpu.pipeline_mode<synchronous>, transform_indices = @transform_9, window_bounds = array<i64: 32, 4>}, {pipeline_mode = #tpu.pipeline_mode<synchronous>, transform_indices = @transform_10, window_bounds = array<i64: 32, 4>}, {pipeline_mode = #tpu.pipeline_mode<synchronous>, transform_indices = @transform_11, window_bounds = array<i64: 256, 256>}, {pipeline_mode = #tpu.pipeline_mode<synchronous>, transform_indices = @transform_12, window_bounds = array<i64: 32, 32>}, {pipeline_mode = #tpu.pipeline_mode<synchronous>, transform_indices = @transform_13, window_bounds = array<i64: 32, 1>}, {pipeline_mode = #tpu.pipeline_mode<synchronous>, transform_indices = @transform_14, window_bounds = array<i64: 9, 32>}, {pipeline_mode = #tpu.pipeline_mode<synchronous>, transform_indices = @transform_15, window_bounds = array<i64: 9, 1>}, {pipeline_mode = #tpu.pipeline_mode<synchronous>, transform_indices = @transform_16, window_bounds = array<i64: 9, 256>}, {pipeline_mode = #tpu.pipeline_mode<synchronous>, transform_indices = @transform_17, window_bounds = array<i64: 32, 1>}, {pipeline_mode = #tpu.pipeline_mode<synchronous>, transform_indices = @transform_18, window_bounds = array<i64: 32, 1>}, {transform_indices = @transform_19, window_bounds = array<i64: 1, 32, 256>}, {transform_indices = @transform_20, window_bounds = array<i64: 1, 1, 256>}, {transform_indices = @transform_21, window_bounds = array<i64: 1, 32, 256>}]} {
    %0 = tpu.iota {dimensions = array<i32: 0>} : vector<4x256xi32>
    %c2_i32 = arith.constant 2 : i32
    %1 = vector.broadcast %c2_i32 : i32 to vector<4x256xi32>
    %2 = arith.cmpi slt, %0, %1 : vector<4x256xi32>
    %3 = tpu.iota {dimensions = array<i32: 0>} : vector<9x256xi32>
    %c0 = arith.constant 0 : index
    %c0_0 = arith.constant 0 : index
    %4 = vector.load %arg17[%c0, %c0_0] : memref<9x256xf32, #tpu.memory_space<vmem>>, vector<9x256xf32>
    %c0_1 = arith.constant 0 : index
    %c0_2 = arith.constant 0 : index
    %c0_3 = arith.constant 0 : index
    %5 = vector.load %arg2[%c0_1, %c0_2, %c0_3] : memref<1x32x256xf32, #tpu.memory_space<vmem>>, vector<1x32x256xf32>
    %6 = vector.shape_cast %5 : vector<1x32x256xf32> to vector<32x256xf32>
    %c0_4 = arith.constant 0 : index
    %c0_5 = arith.constant 0 : index
    %7 = vector.load %arg6[%c0_4, %c0_5] : memref<64x32xf32, #tpu.memory_space<vmem>>, vector<64x32xf32>
    %cst = arith.constant dense<0.000000e+00> : vector<64x256xf32>
    %8 = tpu.matmul %7, %6, %cst {dimension_numbers = #tpu.dot_dimension_numbers<[1], [0], [0], [1], [0, 0, 1, 1], [], []>} : vector<64x32xf32>, vector<32x256xf32>, vector<64x256xf32> -> vector<64x256xf32>
    %c0_6 = arith.constant 0 : index
    %c0_7 = arith.constant 0 : index
    %9 = vector.load %arg7[%c0_6, %c0_7] : memref<64x1xf32, #tpu.memory_space<vmem>>, vector<64x1xf32>
    %10 = vector.broadcast %9 : vector<64x1xf32> to vector<64x256xf32>
    %11 = arith.addf %8, %10 : vector<64x256xf32>
    %c0_8 = arith.constant 0 : index
    %c0_9 = arith.constant 0 : index
    %c0_10 = arith.constant 0 : index
    %12 = vector.load %arg1[%c0_8, %c0_9, %c0_10] : memref<1x1x32xf32, #tpu.memory_space<vmem>>, vector<1x1x32xf32>
    %13 = vector.shape_cast %12 : vector<1x1x32xf32> to vector<1x32xf32>
    %c0_11 = arith.constant 0 : index
    %c0_12 = arith.constant 0 : index
    %14 = vector.load %arg3[%c0_11, %c0_12] : memref<32x64xf32, #tpu.memory_space<vmem>>, vector<32x64xf32>
    %cst_13 = arith.constant dense<0.000000e+00> : vector<1x64xf32>
    %15 = tpu.matmul %13, %14, %cst_13 {dimension_numbers = #tpu.dot_dimension_numbers<[1], [0], [0], [1], [0, 0, 1, 1], [], []>} : vector<1x32xf32>, vector<32x64xf32>, vector<1x64xf32> -> vector<1x64xf32>
    %c0_14 = arith.constant 0 : index
    %c0_15 = arith.constant 0 : index
    %16 = vector.load %arg4[%c0_14, %c0_15] : memref<1x64xf32, #tpu.memory_space<vmem>>, vector<1x64xf32>
    %17 = arith.addf %15, %16 : vector<1x64xf32>
    %c0_16 = arith.constant 0 : index
    %c0_17 = arith.constant 0 : index
    %18 = vector.load %arg5[%c0_16, %c0_17] : memref<4x64xf32, #tpu.memory_space<vmem>>, vector<4x64xf32>
    %19 = vector.broadcast %17 : vector<1x64xf32> to vector<4x64xf32>
    %20 = arith.mulf %18, %19 : vector<4x64xf32>
    %cst_18 = arith.constant dense<0.000000e+00> : vector<4x256xf32>
    %21 = tpu.matmul %20, %11, %cst_18 {dimension_numbers = #tpu.dot_dimension_numbers<[1], [0], [0], [1], [0, 0, 1, 1], [], []>} : vector<4x64xf32>, vector<64x256xf32>, vector<4x256xf32> -> vector<4x256xf32>
    %cst_19 = arith.constant 2.500000e-01 : f32
    %22 = vector.broadcast %cst_19 : f32 to vector<4x256xf32>
    %23 = arith.mulf %21, %22 : vector<4x256xf32>
    %cst_20 = arith.constant dense<0xFF800000> : vector<4xf32>
    %24 = vector.multi_reduction <maximumf>, %23, %cst_20 [1] : vector<4x256xf32> to vector<4xf32>
    %25 = vector.shape_cast %24 : vector<4xf32> to vector<4x1xf32>
    %26 = vector.broadcast %25 : vector<4x1xf32> to vector<4x256xf32>
    %27 = arith.subf %23, %26 : vector<4x256xf32>
    %28 = math.exp %27 : vector<4x256xf32>
    %cst_21 = arith.constant dense<0.000000e+00> : vector<4xf32>
    %29 = vector.multi_reduction <add>, %28, %cst_21 [1] : vector<4x256xf32> to vector<4xf32>
    %30 = vector.shape_cast %29 : vector<4xf32> to vector<4x1xf32>
    %31 = tpu.reciprocal %30 {approx = true} : vector<4x1xf32> -> vector<4x1xf32>
    %32 = vector.broadcast %31 : vector<4x1xf32> to vector<4x256xf32>
    %33 = arith.mulf %28, %32 : vector<4x256xf32>
    %34 = math.absf %23 : vector<4x256xf32>
    %cst_22 = arith.constant 0.000000e+00 : f32
    %35 = vector.broadcast %cst_22 : f32 to vector<4x256xf32>
    %36 = arith.subf %35, %34 : vector<4x256xf32>
    %37 = math.exp %36 : vector<4x256xf32>
    %cst_23 = arith.constant 1.000000e+00 : f32
    %38 = vector.broadcast %cst_23 : f32 to vector<4x256xf32>
    %39 = arith.addf %38, %37 : vector<4x256xf32>
    %40 = tpu.reciprocal %39 {approx = true} : vector<4x256xf32> -> vector<4x256xf32>
    %cst_24 = arith.constant 0.000000e+00 : f32
    %41 = vector.broadcast %cst_24 : f32 to vector<4x256xf32>
    %42 = arith.cmpf oge, %23, %41 : vector<4x256xf32>
    %cst_25 = arith.constant 1.000000e+00 : f32
    %43 = vector.broadcast %cst_25 : f32 to vector<4x256xf32>
    %44 = arith.subf %43, %40 : vector<4x256xf32>
    %45 = arith.select %42, %40, %44 : vector<4x256xi1>, vector<4x256xf32>
    %46 = arith.select %2, %33, %45 : vector<4x256xi1>, vector<4x256xf32>
    %c0_26 = arith.constant 0 : index
    %c0_27 = arith.constant 0 : index
    %47 = vector.load %arg12[%c0_26, %c0_27] : memref<256x256xf32, #tpu.memory_space<vmem>>, vector<256x256xf32>
    %cst_28 = arith.constant dense<0.000000e+00> : vector<4x256xf32>
    %48 = tpu.matmul %46, %47, %cst_28 {dimension_numbers = #tpu.dot_dimension_numbers<[1], [0], [0], [1], [0, 0, 1, 1], [], []>} : vector<4x256xf32>, vector<256x256xf32>, vector<4x256xf32> -> vector<4x256xf32>
    %c0_29 = arith.constant 0 : index
    %c0_30 = arith.constant 0 : index
    %49 = vector.load %arg8[%c0_29, %c0_30] : memref<32x32xf32, #tpu.memory_space<vmem>>, vector<32x32xf32>
    %cst_31 = arith.constant dense<0.000000e+00> : vector<32x256xf32>
    %50 = tpu.matmul %49, %6, %cst_31 {dimension_numbers = #tpu.dot_dimension_numbers<[1], [0], [0], [1], [0, 0, 1, 1], [], []>} : vector<32x32xf32>, vector<32x256xf32>, vector<32x256xf32> -> vector<32x256xf32>
    %c0_32 = arith.constant 0 : index
    %c0_33 = arith.constant 0 : index
    %51 = vector.load %arg9[%c0_32, %c0_33] : memref<32x1xf32, #tpu.memory_space<vmem>>, vector<32x1xf32>
    %52 = vector.broadcast %51 : vector<32x1xf32> to vector<32x256xf32>
    %53 = arith.addf %50, %52 : vector<32x256xf32>
    %c0_34 = arith.constant 0 : index
    %c0_35 = arith.constant 0 : index
    %54 = vector.load %arg10[%c0_34, %c0_35] : memref<32x4xf32, #tpu.memory_space<vmem>>, vector<32x4xf32>
    %cst_36 = arith.constant dense<0.000000e+00> : vector<32x256xf32>
    %55 = tpu.matmul %54, %46, %cst_36 {dimension_numbers = #tpu.dot_dimension_numbers<[1], [0], [0], [1], [0, 0, 1, 1], [], []>} : vector<32x4xf32>, vector<4x256xf32>, vector<32x256xf32> -> vector<32x256xf32>
    %56 = arith.mulf %53, %55 : vector<32x256xf32>
    %cst_37 = arith.constant dense<0.000000e+00> : vector<32xf32>
    %57 = vector.multi_reduction <add>, %56, %cst_37 [1] : vector<32x256xf32> to vector<32xf32>
    %58 = vector.shape_cast %57 : vector<32xf32> to vector<32x1xf32>
    %c0_38 = arith.constant 0 : index
    %c0_39 = arith.constant 0 : index
    %59 = vector.load %arg11[%c0_38, %c0_39] : memref<32x4xf32, #tpu.memory_space<vmem>>, vector<32x4xf32>
    %cst_40 = arith.constant dense<0.000000e+00> : vector<32x256xf32>
    %60 = tpu.matmul %59, %48, %cst_40 {dimension_numbers = #tpu.dot_dimension_numbers<[1], [0], [0], [1], [0, 0, 1, 1], [], []>} : vector<32x4xf32>, vector<4x256xf32>, vector<32x256xf32> -> vector<32x256xf32>
    %61 = vector.broadcast %58 : vector<32x1xf32> to vector<32x256xf32>
    %62 = arith.mulf %61, %60 : vector<32x256xf32>
    %c0_41 = arith.constant 0 : index
    %c0_42 = arith.constant 0 : index
    %63 = vector.load %arg13[%c0_41, %c0_42] : memref<32x32xf32, #tpu.memory_space<vmem>>, vector<32x32xf32>
    %cst_43 = arith.constant dense<0.000000e+00> : vector<32x256xf32>
    %64 = tpu.matmul %63, %62, %cst_43 {dimension_numbers = #tpu.dot_dimension_numbers<[1], [0], [0], [1], [0, 0, 1, 1], [], []>} : vector<32x32xf32>, vector<32x256xf32>, vector<32x256xf32> -> vector<32x256xf32>
    %c0_44 = arith.constant 0 : index
    %c0_45 = arith.constant 0 : index
    %65 = vector.load %arg14[%c0_44, %c0_45] : memref<32x1xf32, #tpu.memory_space<vmem>>, vector<32x1xf32>
    %66 = vector.broadcast %65 : vector<32x1xf32> to vector<32x256xf32>
    %67 = arith.addf %64, %66 : vector<32x256xf32>
    %c0_46 = arith.constant 0 : index
    %c0_47 = arith.constant 0 : index
    %c0_48 = arith.constant 0 : index
    %68 = vector.load %arg22[%c0_46, %c0_47, %c0_48] : memref<1x32x256xf32, #tpu.memory_space<vmem>>, vector<1x32x256xf32>
    %69 = vector.shape_cast %68 : vector<1x32x256xf32> to vector<32x256xf32>
    %70 = vector.shape_cast %67 : vector<32x256xf32> to vector<1x32x256xf32>
    tpu.vector_store %arg22[%c0_46, %c0_47, %c0_48], %70 {strides = array<i32>} : memref<1x32x256xf32, #tpu.memory_space<vmem>>, vector<1x32x256xf32>,
    %c0_49 = arith.constant 0 : index
    %c0_50 = arith.constant 0 : index
    %71 = vector.load %arg15[%c0_49, %c0_50] : memref<9x32xf32, #tpu.memory_space<vmem>>, vector<9x32xf32>
    %cst_51 = arith.constant dense<0.000000e+00> : vector<9x256xf32>
    %72 = tpu.matmul %71, %62, %cst_51 {dimension_numbers = #tpu.dot_dimension_numbers<[1], [0], [0], [1], [0, 0, 1, 1], [], []>} : vector<9x32xf32>, vector<32x256xf32>, vector<9x256xf32> -> vector<9x256xf32>
    %c0_52 = arith.constant 0 : index
    %c0_53 = arith.constant 0 : index
    %73 = vector.load %arg16[%c0_52, %c0_53] : memref<9x1xf32, #tpu.memory_space<vmem>>, vector<9x1xf32>
    %74 = vector.broadcast %73 : vector<9x1xf32> to vector<9x256xf32>
    %75 = arith.addf %72, %74 : vector<9x256xf32>
    %c17_i32 = arith.constant 17 : i32
    %76 = tpu.dynamic_rotate %75 by %c17_i32 dim 1 : vector<9x256xf32>, i32 -> vector<9x256xf32>
    %c0_i32 = arith.constant 0 : i32
    %77 = vector.broadcast %c0_i32 : i32 to vector<9x256xi32>
    %78 = arith.cmpi eq, %3, %77 : vector<9x256xi32>
    %cst_54 = arith.constant 0.000000e+00 : f32
    %79 = vector.broadcast %cst_54 : f32 to vector<9x256xf32>
    %80 = arith.select %78, %76, %79 : vector<9x256xi1>, vector<9x256xf32>
    %c16_i32 = arith.constant 16 : i32
    %81 = tpu.dynamic_rotate %75 by %c16_i32 dim 1 : vector<9x256xf32>, i32 -> vector<9x256xf32>
    %c1_i32 = arith.constant 1 : i32
    %82 = vector.broadcast %c1_i32 : i32 to vector<9x256xi32>
    %83 = arith.cmpi eq, %3, %82 : vector<9x256xi32>
    %cst_55 = arith.constant 0.000000e+00 : f32
    %84 = vector.broadcast %cst_55 : f32 to vector<9x256xf32>
    %85 = arith.select %83, %81, %84 : vector<9x256xi1>, vector<9x256xf32>
    %86 = arith.addf %80, %85 : vector<9x256xf32>
    %c15_i32 = arith.constant 15 : i32
    %87 = tpu.dynamic_rotate %75 by %c15_i32 dim 1 : vector<9x256xf32>, i32 -> vector<9x256xf32>
    %c2_i32_56 = arith.constant 2 : i32
    %88 = vector.broadcast %c2_i32_56 : i32 to vector<9x256xi32>
    %89 = arith.cmpi eq, %3, %88 : vector<9x256xi32>
    %cst_57 = arith.constant 0.000000e+00 : f32
    %90 = vector.broadcast %cst_57 : f32 to vector<9x256xf32>
    %91 = arith.select %89, %87, %90 : vector<9x256xi1>, vector<9x256xf32>
    %92 = arith.addf %86, %91 : vector<9x256xf32>
    %c1_i32_58 = arith.constant 1 : i32
    %93 = tpu.dynamic_rotate %75 by %c1_i32_58 dim 1 : vector<9x256xf32>, i32 -> vector<9x256xf32>
    %c3_i32 = arith.constant 3 : i32
    %94 = vector.broadcast %c3_i32 : i32 to vector<9x256xi32>
    %95 = arith.cmpi eq, %3, %94 : vector<9x256xi32>
    %cst_59 = arith.constant 0.000000e+00 : f32
    %96 = vector.broadcast %cst_59 : f32 to vector<9x256xf32>
    %97 = arith.select %95, %93, %96 : vector<9x256xi1>, vector<9x256xf32>
    %98 = arith.addf %92, %97 : vector<9x256xf32>
    %c4_i32 = arith.constant 4 : i32
    %99 = vector.broadcast %c4_i32 : i32 to vector<9x256xi32>
    %100 = arith.cmpi eq, %3, %99 : vector<9x256xi32>
    %cst_60 = arith.constant 0.000000e+00 : f32
    %101 = vector.broadcast %cst_60 : f32 to vector<9x256xf32>
    %102 = arith.select %100, %75, %101 : vector<9x256xi1>, vector<9x256xf32>
    %103 = arith.addf %98, %102 : vector<9x256xf32>
    %c255_i32 = arith.constant 255 : i32
    %104 = tpu.dynamic_rotate %75 by %c255_i32 dim 1 : vector<9x256xf32>, i32 -> vector<9x256xf32>
    %c5_i32 = arith.constant 5 : i32
    %105 = vector.broadcast %c5_i32 : i32 to vector<9x256xi32>
    %106 = arith.cmpi eq, %3, %105 : vector<9x256xi32>
    %cst_61 = arith.constant 0.000000e+00 : f32
    %107 = vector.broadcast %cst_61 : f32 to vector<9x256xf32>
    %108 = arith.select %106, %104, %107 : vector<9x256xi1>, vector<9x256xf32>
    %109 = arith.addf %103, %108 : vector<9x256xf32>
    %c241_i32 = arith.constant 241 : i32
    %110 = tpu.dynamic_rotate %75 by %c241_i32 dim 1 : vector<9x256xf32>, i32 -> vector<9x256xf32>
    %c6_i32 = arith.constant 6 : i32
    %111 = vector.broadcast %c6_i32 : i32 to vector<9x256xi32>
    %112 = arith.cmpi eq, %3, %111 : vector<9x256xi32>
    %cst_62 = arith.constant 0.000000e+00 : f32
    %113 = vector.broadcast %cst_62 : f32 to vector<9x256xf32>
    %114 = arith.select %112, %110, %113 : vector<9x256xi1>, vector<9x256xf32>
    %115 = arith.addf %109, %114 : vector<9x256xf32>
    %c240_i32 = arith.constant 240 : i32
    %116 = tpu.dynamic_rotate %75 by %c240_i32 dim 1 : vector<9x256xf32>, i32 -> vector<9x256xf32>
    %c7_i32 = arith.constant 7 : i32
    %117 = vector.broadcast %c7_i32 : i32 to vector<9x256xi32>
    %118 = arith.cmpi eq, %3, %117 : vector<9x256xi32>
    %cst_63 = arith.constant 0.000000e+00 : f32
    %119 = vector.broadcast %cst_63 : f32 to vector<9x256xf32>
    %120 = arith.select %118, %116, %119 : vector<9x256xi1>, vector<9x256xf32>
    %121 = arith.addf %115, %120 : vector<9x256xf32>
    %c239_i32 = arith.constant 239 : i32
    %122 = tpu.dynamic_rotate %75 by %c239_i32 dim 1 : vector<9x256xf32>, i32 -> vector<9x256xf32>
    %c8_i32 = arith.constant 8 : i32
    %123 = vector.broadcast %c8_i32 : i32 to vector<9x256xi32>
    %124 = arith.cmpi eq, %3, %123 : vector<9x256xi32>
    %cst_64 = arith.constant 0.000000e+00 : f32
    %125 = vector.broadcast %cst_64 : f32 to vector<9x256xf32>
    %126 = arith.select %124, %122, %125 : vector<9x256xi1>, vector<9x256xf32>
    %127 = arith.addf %121, %126 : vector<9x256xf32>
    %128 = arith.mulf %4, %127 : vector<9x256xf32>
    %cst_65 = arith.constant dense<0.000000e+00> : vector<256xf32>
    %129 = vector.multi_reduction <add>, %128, %cst_65 [0] : vector<9x256xf32> to vector<256xf32>
    %130 = vector.shape_cast %129 : vector<256xf32> to vector<1x256xf32>
    %c0_66 = arith.constant 0 : index
    %c0_67 = arith.constant 0 : index
    %c0_68 = arith.constant 0 : index
    %131 = vector.load %arg21[%c0_66, %c0_67, %c0_68] : memref<1x1x256xf32, #tpu.memory_space<vmem>>, vector<1x1x256xf32>
    %132 = vector.shape_cast %131 : vector<1x1x256xf32> to vector<1x256xf32>
    %133 = vector.shape_cast %130 : vector<1x256xf32> to vector<1x1x256xf32>
    tpu.vector_store %arg21[%c0_66, %c0_67, %c0_68], %133 {strides = array<i32>} : memref<1x1x256xf32, #tpu.memory_space<vmem>>, vector<1x1x256xf32>,
    %c0_69 = arith.constant 0 : index
    %c0_70 = arith.constant 0 : index
    %134 = vector.load %arg18[%c0_69, %c0_70] : memref<32x1xf32, #tpu.memory_space<vmem>>, vector<32x1xf32>
    %135 = vector.broadcast %134 : vector<32x1xf32> to vector<32x256xf32>
    %136 = arith.mulf %67, %135 : vector<32x256xf32>
    %c0_71 = arith.constant 0 : index
    %c0_72 = arith.constant 0 : index
    %137 = vector.load %arg19[%c0_71, %c0_72] : memref<32x1xf32, #tpu.memory_space<vmem>>, vector<32x1xf32>
    %138 = vector.broadcast %137 : vector<32x1xf32> to vector<32x256xf32>
    %139 = arith.addf %136, %138 : vector<32x256xf32>
    %c0_73 = arith.constant 0 : index
    %c0_74 = arith.constant 0 : index
    %c0_75 = arith.constant 0 : index
    %140 = vector.load %arg2[%c0_73, %c0_74, %c0_75] : memref<1x32x256xf32, #tpu.memory_space<vmem>>, vector<1x32x256xf32>
    %141 = vector.shape_cast %140 : vector<1x32x256xf32> to vector<32x256xf32>
    %142 = arith.addf %139, %141 : vector<32x256xf32>
    %cst_76 = arith.constant 0.000000e+00 : f32
    %143 = vector.broadcast %cst_76 : f32 to vector<32x256xf32>
    %144 = arith.cmpf oge, %142, %143 : vector<32x256xf32>
    %cst_77 = arith.constant 1.000000e-01 : f32
    %145 = vector.broadcast %cst_77 : f32 to vector<32x256xf32>
    %146 = arith.mulf %145, %142 : vector<32x256xf32>
    %147 = arith.select %144, %142, %146 : vector<32x256xi1>, vector<32x256xf32>
    %c0_78 = arith.constant 0 : index
    %c0_79 = arith.constant 0 : index
    %c0_80 = arith.constant 0 : index
    %148 = vector.load %arg20[%c0_78, %c0_79, %c0_80] : memref<1x32x256xf32, #tpu.memory_space<vmem>>, vector<1x32x256xf32>
    %149 = vector.shape_cast %148 : vector<1x32x256xf32> to vector<32x256xf32>
    %150 = vector.shape_cast %147 : vector<32x256xf32> to vector<1x32x256xf32>
    tpu.vector_store %arg20[%c0_78, %c0_79, %c0_80], %150 {strides = array<i32>} : memref<1x32x256xf32, #tpu.memory_space<vmem>>, vector<1x32x256xf32>,
    return
  }
  func.func @transform_0(%arg0: i32) -> (i32, i32, i32) {
    %c0_i32 = arith.constant 0 : i32
    %c0_i32_0 = arith.constant 0 : i32
    %c0_i32_1 = arith.constant 0 : i32
    return %arg0, %c0_i32, %c0_i32_0 : i32, i32, i32
  }
  func.func @transform_1(%arg0: i32) -> (i32, i32, i32) {
    %c0_i32 = arith.constant 0 : i32
    %c0_i32_0 = arith.constant 0 : i32
    %c0_i32_1 = arith.constant 0 : i32
    return %arg0, %c0_i32, %c0_i32_0 : i32, i32, i32
  }
  func.func @transform_2(%arg0: i32) -> (i32, i32) {
    %c0_i32 = arith.constant 0 : i32
    %c0_i32_0 = arith.constant 0 : i32
    %c0_i32_1 = arith.constant 0 : i32
    return %c0_i32, %c0_i32_0 : i32, i32
  }
  func.func @transform_3(%arg0: i32) -> (i32, i32) {
    %c0_i32 = arith.constant 0 : i32
    %c0_i32_0 = arith.constant 0 : i32
    %c0_i32_1 = arith.constant 0 : i32
    return %c0_i32, %c0_i32_0 : i32, i32
  }
  func.func @transform_4(%arg0: i32) -> (i32, i32) {
    %c0_i32 = arith.constant 0 : i32
    %c0_i32_0 = arith.constant 0 : i32
    %c0_i32_1 = arith.constant 0 : i32
    return %c0_i32, %c0_i32_0 : i32, i32
  }
  func.func @transform_5(%arg0: i32) -> (i32, i32) {
    %c0_i32 = arith.constant 0 : i32
    %c0_i32_0 = arith.constant 0 : i32
    %c0_i32_1 = arith.constant 0 : i32
    return %c0_i32, %c0_i32_0 : i32, i32
  }
  func.func @transform_6(%arg0: i32) -> (i32, i32) {
    %c0_i32 = arith.constant 0 : i32
    %c0_i32_0 = arith.constant 0 : i32
    %c0_i32_1 = arith.constant 0 : i32
    return %c0_i32, %c0_i32_0 : i32, i32
  }
  func.func @transform_7(%arg0: i32) -> (i32, i32) {
    %c0_i32 = arith.constant 0 : i32
    %c0_i32_0 = arith.constant 0 : i32
    %c0_i32_1 = arith.constant 0 : i32
    return %c0_i32, %c0_i32_0 : i32, i32
  }
  func.func @transform_8(%arg0: i32) -> (i32, i32) {
    %c0_i32 = arith.constant 0 : i32
    %c0_i32_0 = arith.constant 0 : i32
    %c0_i32_1 = arith.constant 0 : i32
    return %c0_i32, %c0_i32_0 : i32, i32
  }
  func.func @transform_9(%arg0: i32) -> (i32, i32) {
    %c0_i32 = arith.constant 0 : i32
    %c0_i32_0 = arith.constant 0 : i32
    %c0_i32_1 = arith.constant 0 : i32
    return %c0_i32, %c0_i32_0 : i32, i32
  }
  func.func @transform_10(%arg0: i32) -> (i32, i32) {
    %c0_i32 = arith.constant 0 : i32
    %c0_i32_0 = arith.constant 0 : i32
    %c0_i32_1 = arith.constant 0 : i32
    return %c0_i32, %c0_i32_0 : i32, i32
  }
  func.func @transform_11(%arg0: i32) -> (i32, i32) {
    %c0_i32 = arith.constant 0 : i32
    %c0_i32_0 = arith.constant 0 : i32
    %c0_i32_1 = arith.constant 0 : i32
    return %c0_i32, %c0_i32_0 : i32, i32
  }
  func.func @transform_12(%arg0: i32) -> (i32, i32) {
    %c0_i32 = arith.constant 0 : i32
    %c0_i32_0 = arith.constant 0 : i32
    %c0_i32_1 = arith.constant 0 : i32
    return %c0_i32, %c0_i32_0 : i32, i32
  }
  func.func @transform_13(%arg0: i32) -> (i32, i32) {
    %c0_i32 = arith.constant 0 : i32
    %c0_i32_0 = arith.constant 0 : i32
    %c0_i32_1 = arith.constant 0 : i32
    return %c0_i32, %c0_i32_0 : i32, i32
  }
  func.func @transform_14(%arg0: i32) -> (i32, i32) {
    %c0_i32 = arith.constant 0 : i32
    %c0_i32_0 = arith.constant 0 : i32
    %c0_i32_1 = arith.constant 0 : i32
    return %c0_i32, %c0_i32_0 : i32, i32
  }
  func.func @transform_15(%arg0: i32) -> (i32, i32) {
    %c0_i32 = arith.constant 0 : i32
    %c0_i32_0 = arith.constant 0 : i32
    %c0_i32_1 = arith.constant 0 : i32
    return %c0_i32, %c0_i32_0 : i32, i32
  }
  func.func @transform_16(%arg0: i32) -> (i32, i32) {
    %c0_i32 = arith.constant 0 : i32
    %c0_i32_0 = arith.constant 0 : i32
    %c0_i32_1 = arith.constant 0 : i32
    return %c0_i32, %c0_i32_0 : i32, i32
  }
  func.func @transform_17(%arg0: i32) -> (i32, i32) {
    %c0_i32 = arith.constant 0 : i32
    %c0_i32_0 = arith.constant 0 : i32
    %c0_i32_1 = arith.constant 0 : i32
    return %c0_i32, %c0_i32_0 : i32, i32
  }
  func.func @transform_18(%arg0: i32) -> (i32, i32) {
    %c0_i32 = arith.constant 0 : i32
    %c0_i32_0 = arith.constant 0 : i32
    %c0_i32_1 = arith.constant 0 : i32
    return %c0_i32, %c0_i32_0 : i32, i32
  }
  func.func @transform_19(%arg0: i32) -> (i32, i32, i32) {
    %c0_i32 = arith.constant 0 : i32
    %c0_i32_0 = arith.constant 0 : i32
    %c0_i32_1 = arith.constant 0 : i32
    return %arg0, %c0_i32, %c0_i32_0 : i32, i32, i32
  }
  func.func @transform_20(%arg0: i32) -> (i32, i32, i32) {
    %c0_i32 = arith.constant 0 : i32
    %c0_i32_0 = arith.constant 0 : i32
    %c0_i32_1 = arith.constant 0 : i32
    return %arg0, %c0_i32, %c0_i32_0 : i32, i32, i32
  }
  func.func @transform_21(%arg0: i32) -> (i32, i32, i32) {
    %c0_i32 = arith.constant 0 : i32
    %c0_i32_0 = arith.constant 0 : i32
    %c0_i32_1 = arith.constant 0 : i32
    return %arg0, %c0_i32, %c0_i32_0 : i32, i32, i32
  }
}

</mosaic_0001>

<bundles_post_ra>
// kernel: garan_attention_forward.1
= control target key start
LH: loop header
LB: loop body
LE: loop exit
PB: predicated region body
PF: predicated region fallthrough
CT: control target
= control target key end

     0   :  { %s3216_s0 = inlined_call_operand.vmem [shape: f32[2,1,32], index: 0, kind: input, shape index: {}]   ;;  %s3217_s1 = inlined_call_operand.vmem [shape: f32[2,32,256], index: 1, kind: input, shape index: {}]   ;;  %s3218_s2 = inlined_call_operand.vmem [shape: f32[32,64], index: 2, kind: input, shape index: {}]   ;;  %s3219_s3 = inlined_call_operand.vmem [shape: f32[1,64], index: 3, kind: input, shape index: {}]   ;;  %s3220_s4 = inlined_call_operand.vmem [shape: f32[4,64], index: 4, kind: input, shape index: {}]   ;;  %s3221_s5 = inlined_call_operand.vmem [shape: f32[64,32], index: 5, kind: input, shape index: {}]   ;;  %s3222_s6 = inlined_call_operand.vmem [shape: f32[64,1], index: 6, kind: input, shape index: {}]   ;;  %s3223_s7 = inlined_call_operand.vmem [shape: f32[32,32], index: 7, kind: input, shape index: {}]   ;;  %s3224_s8 = inlined_call_operand.vmem [shape: f32[32,1], index: 8, kind: input, shape index: {}]   ;;  %s3225_s9 = inlined_call_operand.vmem [shape: f32[32,4], index: 9, kind: input, shape index: {}]   ;;  %s3226_s10 = inlined_call_operand.vmem [shape: f32[32,4], index: 10, kind: input, shape index: {}]   ;;  %s3227_s11 = inlined_call_operand.vmem [shape: f32[256,256], index: 11, kind: input, shape index: {}]   ;;  %s3228_s12 = inlined_call_operand.vmem [shape: f32[32,32], index: 12, kind: input, shape index: {}]   ;;  %s3229_s13 = inlined_call_operand.vmem [shape: f32[32,1], index: 13, kind: input, shape index: {}]   ;;  %s3230_s14 = inlined_call_operand.vmem [shape: f32[9,32], index: 14, kind: input, shape index: {}]   ;;  %s3231_s15 = inlined_call_operand.vmem [shape: f32[9,1], index: 15, kind: input, shape index: {}]   ;;  %s3232_s16 = inlined_call_operand.vmem [shape: f32[9,256], index: 16, kind: input, shape index: {}]   ;;  %s3233_s17 = inlined_call_operand.vmem [shape: f32[32,1], index: 17, kind: input, shape index: {}]   ;;  %s3234_s18 = inlined_call_operand.vmem [shape: f32[32,1], index: 18, kind: input, shape index: {}]   ;;  %s3235_s19 = inlined_call_operand.vmem [shape: f32[2,32,256], index: 19, kind: output, shape index: {0}]   ;;  %s3236_s20 = inlined_call_operand.vmem [shape: f32[2,1,256], index: 20, kind: output, shape index: {1}]   ;;  %s3237_s21 = inlined_call_operand.vmem [shape: f32[2,32,256], index: 21, kind: output, shape index: {2}]  }
   0x1   :  { %3241 = sst [smem:[#allocation3_spill]] %s3216_s0 }
   0x2   :  { %3242 = sst [smem:[#allocation4_spill]] %s3217_s1 }
   0x3   :  { %3243 = sst [smem:[#allocation5_spill]] %s3218_s2  ;;  %s2562_s2 = smov 0  }
   0x4   :  { %3244 = sst [smem:[#allocation6_spill]] %s3219_s3 }
   0x5   :  { %3245 = sst [smem:[#allocation7_spill]] %s3220_s4 }
   0x6   :  { %3246 = sst [smem:[#allocation8_spill]] %s3221_s5 }
   0x7   :  { %3247 = sst [smem:[#allocation9_spill]] %s3235_s19 }
   0x8   :  { %3248 = sst [smem:[#allocation10_spill]] %s3236_s20 }
   0x9 LB: > { %3249 = sst [smem:[#allocation2_spill]] %s2438_s2  ;;  %s2331_s25 = sadd.s32 4294967295, %s2438_s2   ;;  %s2438_s2 = sphi %s2562_s2, %s32_s2  }
   0xa   : > { %p2335_p0 = scmp.ge.s32.totalorder %s2438_s2, 1  ;;  %p600_p1 = scmp.lt.s32.totalorder %s2438_s2, 3 }
   0xc   : > { %p601_p2 = pnand %p2335_p0, %p600_p1 }
   0xd   : > { %p672_p3 = scmp.lt.s32.totalorder (!%p601_p2), %s2331_s25, 1  ;;  %s3250_s3 = sld [smem:[#allocation5_spill]] (!%p601_p2) }
   0xe   : > { %604 = sbr.rel (%p601_p2) target bundleno = 1580 (0x62c), region = 96  ;;  %s3251_s23 = sld [smem:[#allocation3_spill]] (!%p601_p2) }
   0xf   : > { %s3252_s20 = sld [smem:[#allocation4_spill]] (!%p601_p2)  ;;  %s2445_s27 = smov (!%p601_p2), 15  }
  0x10   : > { %s3253_s24 = sld [smem:[#allocation8_spill]] (!%p601_p2)  ;;  %s2446_s28 = smov (!%p601_p2), 1  }
  0x11   : > { %s3254_s26 = sld [smem:[#allocation6_spill]] (!%p601_p2)  ;;  %s2448_s4 = smov (!%p601_p2), 113  }
  0x12   : > { %s3255_s29 = sld [smem:[#allocation7_spill]] (!%p601_p2)  ;;  %s2449_s30 = smov (!%p601_p2), 112  }
  0x13   : > { %v2440_v0 = vmov 0.0   ;;  %s3260_s25 = smov (!%p672_p3, %s2331_s25), 1  ;;  %v908_v1 = vld [vmem:[%s3250_s3 + $0x18] sm:$0xff]  ;;  %vm2441_vm0 = vmmov 0   ;;  %v2442_v2 = vmov 0   ;;  %v907_v3 = vld [vmem:[%s3250_s3 + $0x10] sm:$0xff]  ;;  %v694_v51 = vlaneseq }
  0x14   : > { %855 = vmatprep.mubr.f32.mxu0 %v2440_v0  ;;  %2385 = vmatprep.subr.mxu1 %v2440_v0  ;;  %s2582_s0 = sshll.u32 %s3260_s25, 6  ;;  %v906_v4 = vld [vmem:[%s3250_s3 + $0x8] sm:$0xff]  ;;  %s674_s1 = scalar_lea.vmem %s3251_s23, %s3260_s25  ;;  %v725_v6 = vld [vmem:[%s3222_s6 + $0x38] sm:$0xff]  ;;  %v905_v7 = vld [vmem:[%s3250_s3] sm:$0xff]  ;;  %vm766_vm1 = vcmask 261120   ;;  %vm989_vm2 = vcmask 523264  }
  0x15   : > { %2393 = vmatprep.mubr.msk.f32.mxu1 %vm2441_vm0, %v2440_v0  ;;  %2417 = vset.pattern.permute.xlu1 %v2442_v2  ;;  %v723_v5 = vld [vmem:[%s3222_s6 + $0x28] sm:$0xff]  ;;  %s2602_s19 = scalar_lea.vmem %s3252_s20, %s2582_s0  ;;  %v904_v12 = vld [vmem:[%s674_s1] sm:$0x1]  ;;  %v724_v16 = vld [vmem:[%s3222_s6 + $0x30] sm:$0xff]  ;;  %v2701_v57 = vshrl.u32 %v694_v51, 7  ;;  %vm1066_vm3 = vcmask 1043456   ;;  %s3065_s23 = scalar_lea.vmem %s3237_s21, %s2582_s0 }
  0x16   : > { %2386 = vmatpush3.msra.mxu1 %v908_v1  ;;  %2416 = vset.pattern.permute.xlu0 %v2442_v2  ;;  %v2608_v8 = vld [vmem:[%s2602_s19 + $0x38] sm:$0xff]  ;;  %v2611_v9 = vld [vmem:[%s2602_s19 + $0x30] sm:$0xff]  ;;  %v2614_v10 = vld [vmem:[%s2602_s19 + $0x28] sm:$0xff]  ;;  %vm1374_vm7 = vcmask 31744   ;;  %s2443_s1 = smov 16   ;;  %s2450_s20 = smov 111  }
  0x17   : > { %2387 = vmatprep.subr.mxu1 %v2440_v0  ;;  %753 = vperm.xlu1 %2417, %v723_v5   ;;  %v2619_v11 = vld [vmem:[%s2602_s19 + $0x20] sm:$0xff]  ;;  %v2623_v13 = vld [vmem:[%s2602_s19 + $0x18] sm:$0xff]  ;;  %v2631_v15 = vld [vmem:[%s2602_s19 + $0x10] sm:$0xff]  ;;  %vm696_vm4 = vcmp.lt.s32.totalorder %v2701_v57, 2  ;;  %vm1889_vm10 = vcmp.eq.s32.totalorder %v2701_v57, 1  ;;  %vm1870_vm12 = vcmp.eq.s32.totalorder %v2701_v57, 0 }
  0x18   : > { %2388 = vmatpush3.msra.mxu1 %v907_v3  ;;  %763 = vperm.xlu0 %2416, %v725_v6   ;;  %v722_v14 = vld [vmem:[%s3222_s6 + $0x20] sm:$0xff]  ;;  %v2638_v17 = vld [vmem:[%s2602_s19 + $0x8] sm:$0xff]  ;;  %v720_v20 = vld [vmem:[%s3222_s6 + $0x10] sm:$0xff]  ;;  %v986_v3 = vsub.s32 0, %v2701_v57  ;;  %vm1912_vm13 = vcmp.eq.s32.totalorder %v2701_v57, 2  ;;  %vm1935_vm15 = vcmp.eq.s32.totalorder %v2701_v57, 3 }
  0x19   : > { %2389 = vmatprep.subr.mxu1 %v2440_v0  ;;  %815 = vmatprep.subr.mxu0 %v2608_v8  ;;  %v2643_v18 = vld [vmem:[%s2602_s19] sm:$0xff]  ;;  %v721_v21 = vld [vmem:[%s3222_s6 + $0x18] sm:$0xff]  ;;  %v711_v22 = vld [vmem:[%s3253_s24 + $0x8] sm:$0xff]  ;;  %s3256_s22 = sld [smem:[#allocation9_spill]] }
  0x1a   : > { %2390 = vmatpush3.msra.mxu1 %v906_v4  ;;  %816 = vmatpush1.msra.mxu0 %v2611_v9  ;;  %v710_v19 = vld [vmem:[%s3253_s24] sm:$0xff]  ;;  %v719_v24 = vld [vmem:[%s3222_s6 + $0x8] sm:$0xff]  ;;  %v712_v25 = vld [vmem:[%s3253_s24 + $0x10] sm:$0xff] }
  0x1b   : > { %2391 = vmatprep.subr.mxu1 %v2440_v0  ;;  %817 = vmatprep.subr.mxu0 %v2614_v10  ;;  %v718_v23 = vld [vmem:[%s3222_s6] sm:$0xff]  ;;  %v713_v26 = vld [vmem:[%s3253_s24 + $0x18] sm:$0xff]  ;;  %v715_v28 = vld [vmem:[%s3253_s24 + $0x28] sm:$0xff] }
  0x1c   : > { %2392 = vmatpush3.msra.mxu1 %v905_v7  ;;  %818 = vmatpush1.msra.mxu0 %v2619_v11  ;;  %v714_v27 = vld [vmem:[%s3253_s24 + $0x20] sm:$0xff]  ;;  %v716_v29 = vld [vmem:[%s3253_s24 + $0x30] sm:$0xff]  ;;  %v717_v30 = vld [vmem:[%s3253_s24 + $0x38] sm:$0xff] }
  0x1d   : > { %2394 = vmatmul.mubr.msk.f32.vlgmr.msra.gmra.mxu1 %vm766_vm1, %v904_v12  ;;  %819 = vmatprep.subr.mxu0 %v2623_v13  ;;  %v909_v59 = vld [vmem:[%s3254_s26] sm:$0x1]  ;;  %s2444_s26 = smov 17  }
  0x1e   : > { %748 = vperm.xlu1 %2417, %v722_v14   ;;  %820 = vmatpush1.msra.mxu0 %v2631_v15 }
  0x1f   : > { %758 = vperm.xlu0 %2416, %v724_v16   ;;  %821 = vmatprep.subr.mxu0 %v2638_v17 }
  0x20   : > { %1057 = vmatprep.mubr.f32.mxu1 %v2440_v0  ;;  %822 = vmatpush1.msra.mxu0 %v2643_v18 }
  0x21   : > { %2343 = vmatmul.mubr.msk.f32.vlgmr.msra.gmra.mxu0 %vm766_vm1, %v710_v19  ;;  %v983_v19 = vld [vmem:[%s3255_s29] sm:$0xf]  ;;  %s2447_s29 = smov 127  }
  0x22   : > { %738 = vperm.xlu1 %2417, %v720_v20   ;;  %861 = vmatprep.mubr.f32.mxu0 %v2440_v0 }
  0x23   : > { %743 = vperm.xlu0 %2416, %v721_v21  }
  0x25   : > { %2344 = vmatmul.mubr.msk.f32.gmra.mxu0 %vm766_vm1, %v711_v22 }
  0x26   : > { %728 = vperm.xlu1 %2417, %v718_v23   ;;  %867 = vmatprep.mubr.f32.mxu0 %v2440_v0 }
  0x27   : > { %733 = vperm.xlu0 %2416, %v719_v24  }
  0x29   : > { %2345 = vmatmul.mubr.msk.f32.gmra.mxu0 %vm766_vm1, %v712_v25 }
  0x2a   : > { %873 = vmatprep.mubr.f32.mxu0 %v2440_v0 }
  0x2d   : > { %2346 = vmatmul.mubr.msk.f32.gmra.mxu0 %vm766_vm1, %v713_v26  ;;  %v1241_v26 = vld [vmem:[%s3223_s7] sm:$0xff] }
  0x2e   : > { %879 = vmatprep.mubr.f32.mxu0 %v2440_v0 }
  0x31   : > { %2347 = vmatmul.mubr.msk.f32.gmra.mxu0 %vm766_vm1, %v714_v27 }
  0x32   : > { %885 = vmatprep.mubr.f32.mxu0 %v2440_v0 }
  0x35   : > { %2348 = vmatmul.mubr.msk.f32.gmra.mxu0 %vm766_vm1, %v715_v28 }
  0x36   : > { %891 = vmatprep.mubr.f32.mxu0 %v2440_v0 }
  0x39   : > { %2349 = vmatmul.mubr.msk.f32.gmra.mxu0 %vm766_vm1, %v716_v29  ;;  %v1248_v29 = vld [vmem:[%s3224_s8 + $0x18] sm:$0xff] }
  0x3a   : > { %897 = vmatprep.mubr.f32.mxu0 %v2440_v0 }
  0x3d   : > { %2350 = vmatmul.mubr.msk.f32.gmra.mxu0 %vm766_vm1, %v717_v30  ;;  %v1246_v30 = vld [vmem:[%s3224_s8 + $0x8] sm:$0xff] }
  0x92   : > { %v754_v47 = vpop.permute.xlu1 %753 }
  0x93   : > { %v764_v45 = vpop.permute.xlu0 %763 }
  0x99   : > { %v749_v53 = vpop.permute.xlu1 %748 }
  0x9a   : > { %v759_v50 = vpop.permute.xlu0 %758 }
  0x9d   : > { %v739_v63 = vpop.permute.xlu1 %738 }
  0x9e   : > { %v744_v60 = vpop.permute.xlu0 %743 }
  0xa1   : > { %v729_v20 = vpop.permute.xlu1 %728 }
  0xa2   : > { %v734_v7 = vpop.permute.xlu0 %733 }
  0xdd   : > { %v979_v31 = vpop.f32.mrf.mxu1 }
  0xde   : > { %v980_v2 = vadd.f32 %v979_v31, %v909_v59  ;;  %v1137_v31 = vld [vmem:[%s3227_s11 + $0xf8] sm:$0xff]  ;;  %v1111_v59 = vld [vmem:[%s3227_s11 + $0x28] sm:$0xff] }
  0xdf   : > { %v2395_v32 = vpop.f32.mrf.mxu1  ;;  %1170 = vmatprep.subr.mxu0 %v1137_v31  ;;  %v1152_v31 = vld [vmem:[%s3227_s11 + $0x170] sm:$0xff] }
  0xe0   : > { %v987_v14 = vrot.slane %v980_v2, %v986_v3  ;;  %v1136_v32 = vld [vmem:[%s3227_s11 + $0xf0] sm:$0xff]  ;;  %v1169_v2 = vld [vmem:[%s3227_s11 + $0x1f8] sm:$0xff] }
  0xe1   : > { %v857_v33 = vpop.f32.mrf.mxu0  ;;  %1171 = vmatpush1.msra.mxu0 %v1136_v32  ;;  %v1168_v3 = vld [vmem:[%s3227_s11 + $0x1f0] sm:$0xff] }
  0xe2   : > { %v988_v24 = vmul.f32 %v987_v14, %v983_v19  ;;  %v858_v25 = vadd.f32 %v857_v33, %v729_v20  ;;  %v1135_v33 = vld [vmem:[%s3227_s11 + $0xe8] sm:$0xff]  ;;  %v1162_v14 = vld [vmem:[%s3227_s11 + $0x1c0] sm:$0xff]  ;;  %v1160_v19 = vld [vmem:[%s3227_s11 + $0x1b0] sm:$0xff] }
  0xe3   : > { %v859_v34 = vpop.f32.mrf.mxu0  ;;  %1172 = vmatprep.subr.mxu0 %v1135_v33  ;;  %v1247_v32 = vld [vmem:[%s3224_s8 + $0x10] sm:$0xff]  ;;  %v1151_v33 = vld [vmem:[%s3227_s11 + $0x168] sm:$0xff] }
  0xe4   : > { %v860_v23 = vadd.f32 %v859_v34, %v729_v20  ;;  %v1134_v34 = vld [vmem:[%s3227_s11 + $0xe0] sm:$0xff]  ;;  %v1159_v20 = vld [vmem:[%s3227_s11 + $0x1a8] sm:$0xff] }
  0xe5   : > { %v863_v35 = vpop.f32.mrf.mxu0  ;;  %1173 = vmatpush1.msra.mxu0 %v1134_v34  ;;  %v1150_v34 = vld [vmem:[%s3227_s11 + $0x160] sm:$0xff] }
  0xe6   : > { %v864_v22 = vadd.f32 %v863_v35, %v734_v7  ;;  %v1133_v35 = vld [vmem:[%s3227_s11 + $0xd8] sm:$0xff] }
  0xe7   : > { %v865_v36 = vpop.f32.mrf.mxu0  ;;  %1174 = vmatprep.subr.mxu0 %v1133_v35  ;;  %v1149_v35 = vld [vmem:[%s3227_s11 + $0x158] sm:$0xff] }
  0xe8   : > { %v866_v21 = vadd.f32 %v865_v36, %v734_v7  ;;  %v1132_v36 = vld [vmem:[%s3227_s11 + $0xd0] sm:$0xff] }
  0xe9   : > { %v869_v37 = vpop.f32.mrf.mxu0  ;;  %1175 = vmatpush1.msra.mxu0 %v1132_v36  ;;  %v1164_v7 = vld [vmem:[%s3227_s11 + $0x1d0] sm:$0xff] }
  0xea   : > { %v870_v16 = vadd.f32 %v869_v37, %v739_v63  ;;  %v1131_v37 = vld [vmem:[%s3227_s11 + $0xc8] sm:$0xff]  ;;  %v1148_v36 = vld [vmem:[%s3227_s11 + $0x150] sm:$0xff] }
  0xeb   : > { %v871_v38 = vpop.f32.mrf.mxu0  ;;  %1176 = vmatprep.subr.mxu0 %v1131_v37  ;;  %v1245_v37 = vld [vmem:[%s3224_s8] sm:$0xff] }
  0xec   : > { %v872_v12 = vadd.f32 %v871_v38, %v739_v63  ;;  %v1130_v38 = vld [vmem:[%s3227_s11 + $0xc0] sm:$0xff]  ;;  %v1107_v63 = vld [vmem:[%s3227_s11 + $0x8] sm:$0xff] }
  0xed   : > { %v875_v39 = vpop.f32.mrf.mxu0  ;;  %1177 = vmatpush1.msra.mxu0 %v1130_v38  ;;  %v1147_v38 = vld [vmem:[%s3227_s11 + $0x148] sm:$0xff] }
  0xee   : > { %v876_v6 = vadd.f32 %v875_v39, %v744_v60  ;;  %v1129_v39 = vld [vmem:[%s3227_s11 + $0xb8] sm:$0xff] }
  0xef   : > { %v877_v40 = vpop.f32.mrf.mxu0  ;;  %1178 = vmatprep.subr.mxu0 %v1129_v39  ;;  %v1146_v39 = vld [vmem:[%s3227_s11 + $0x140] sm:$0xff] }
  0xf0   : > { %v878_v5 = vadd.f32 %v877_v40, %v744_v60  ;;  %v1128_v40 = vld [vmem:[%s3227_s11 + $0xb0] sm:$0xff]  ;;  %v1110_v60 = vld [vmem:[%s3227_s11 + $0x20] sm:$0xff] }
  0xf1   : > { %v881_v41 = vpop.f32.mrf.mxu0  ;;  %1179 = vmatpush1.msra.mxu0 %v1128_v40  ;;  %v1145_v40 = vld [vmem:[%s3227_s11 + $0x138] sm:$0xff] }
  0xf2   : > { %v882_v4 = vadd.f32 %v881_v41, %v749_v53  ;;  %v1127_v41 = vld [vmem:[%s3227_s11 + $0xa8] sm:$0xff] }
  0xf3   : > { %v883_v42 = vpop.f32.mrf.mxu0  ;;  %1180 = vmatprep.subr.mxu0 %v1127_v41  ;;  %v1144_v41 = vld [vmem:[%s3227_s11 + $0x130] sm:$0xff] }
  0xf4   : > { %v884_v1 = vadd.f32 %v883_v42, %v749_v53  ;;  %v1126_v42 = vld [vmem:[%s3227_s11 + $0xa0] sm:$0xff]  ;;  %v1116_v53 = vld [vmem:[%s3227_s11 + $0x50] sm:$0xff] }
  0xf5   : > { %v887_v43 = vpop.f32.mrf.mxu0  ;;  %1181 = vmatpush1.msra.mxu0 %v1126_v42  ;;  %v1143_v42 = vld [vmem:[%s3227_s11 + $0x128] sm:$0xff] }
  0xf6   : > { %v888_v62 = vadd.f32 %v887_v43, %v754_v47  ;;  %v1125_v43 = vld [vmem:[%s3227_s11 + $0x98] sm:$0xff] }
  0xf7   : > { %v889_v44 = vpop.f32.mrf.mxu0  ;;  %1182 = vmatprep.subr.mxu0 %v1125_v43  ;;  %v1142_v43 = vld [vmem:[%s3227_s11 + $0x120] sm:$0xff] }
  0xf8   : > { %v890_v61 = vadd.f32 %v889_v44, %v754_v47  ;;  %v1124_v44 = vld [vmem:[%s3227_s11 + $0x90] sm:$0xff]  ;;  %v1121_v47 = vld [vmem:[%s3227_s11 + $0x78] sm:$0xff] }
  0xf9   : > { %v893_v46 = vpop.f32.mrf.mxu0  ;;  %1183 = vmatpush1.msra.mxu0 %v1124_v44  ;;  %v1141_v44 = vld [vmem:[%s3227_s11 + $0x118] sm:$0xff] }
  0xfa   : > { %v894_v58 = vadd.f32 %v893_v46, %v759_v50  ;;  %v1122_v46 = vld [vmem:[%s3227_s11 + $0x80] sm:$0xff] }
  0xfb   : > { %v895_v48 = vpop.f32.mrf.mxu0 }
  0xfc   : > { %v896_v56 = vadd.f32 %v895_v48, %v759_v50  ;;  %v1120_v48 = vld [vmem:[%s3227_s11 + $0x70] sm:$0xff]  ;;  %v1118_v50 = vld [vmem:[%s3227_s11 + $0x60] sm:$0xff] }
  0xfd   : > { %v899_v49 = vpop.f32.mrf.mxu0 }
  0xfe   : > { %v900_v55 = vadd.f32 %v899_v49, %v764_v45  ;;  %v1119_v49 = vld [vmem:[%s3227_s11 + $0x68] sm:$0xff] }
  0xff   : > { %v901_v52 = vpop.f32.mrf.mxu0 }
 0x100   : > { %v902_v54 = vadd.f32 %v901_v52, %v764_v45  ;;  %v1123_v45 = vld [vmem:[%s3227_s11 + $0x88] sm:$0xff]  ;;  %v1117_v52 = vld [vmem:[%s3227_s11 + $0x58] sm:$0xff] }
 0x101   : > { %1184 = vmatprep.subr.mxu0 %v1123_v45  ;;  %v1140_v45 = vld [vmem:[%s3227_s11 + $0x110] sm:$0xff] }
 0x102   : > { %1009 = vmatprep.subr.mxu1 %v902_v54  ;;  %1185 = vmatpush1.msra.mxu0 %v1122_v46  ;;  %v1115_v54 = vld [vmem:[%s3227_s11 + $0x48] sm:$0xff] }
 0x103   : > { %1010 = vmatpush1.msra.mxu1 %v900_v55  ;;  %1186 = vmatprep.subr.mxu0 %v1121_v47  ;;  %v1114_v55 = vld [vmem:[%s3227_s11 + $0x40] sm:$0xff]  ;;  %v1139_v46 = vld [vmem:[%s3227_s11 + $0x108] sm:$0xff] }
 0x104   : > { %1011 = vmatprep.subr.mxu1 %v896_v56  ;;  %1187 = vmatpush1.msra.mxu0 %v1120_v48  ;;  %v1113_v56 = vld [vmem:[%s3227_s11 + $0x38] sm:$0xff]  ;;  %v1138_v47 = vld [vmem:[%s3227_s11 + $0x100] sm:$0xff] }
 0x105   : > { %1012 = vmatpush1.msra.mxu1 %v894_v58  ;;  %1188 = vmatprep.subr.mxu0 %v1119_v49  ;;  %v1112_v58 = vld [vmem:[%s3227_s11 + $0x30] sm:$0xff] }
 0x106   : > { %1013 = vmatprep.subr.mxu1 %v890_v61  ;;  %1189 = vmatpush1.msra.mxu0 %v1118_v50  ;;  %v1109_v61 = vld [vmem:[%s3227_s11 + $0x18] sm:$0xff] }
 0x107   : > { %1014 = vmatpush1.msra.mxu1 %v888_v62  ;;  %1190 = vmatprep.subr.mxu0 %v1117_v52  ;;  %v1108_v62 = vld [vmem:[%s3227_s11 + $0x10] sm:$0xff] }
 0x108   : > { %1015 = vmatprep.subr.mxu1 %v884_v1  ;;  %1191 = vmatpush1.msra.mxu0 %v1116_v53  ;;  %v1106_v1 = vld [vmem:[%s3227_s11] sm:$0xff] }
 0x109   : > { %1016 = vmatpush1.msra.mxu1 %v882_v4  ;;  %1192 = vmatprep.subr.mxu0 %v1115_v54  ;;  %v1167_v4 = vld [vmem:[%s3227_s11 + $0x1e8] sm:$0xff] }
 0x10a   : > { %1017 = vmatprep.subr.mxu1 %v878_v5  ;;  %1193 = vmatpush1.msra.mxu0 %v1114_v55  ;;  %v1166_v5 = vld [vmem:[%s3227_s11 + $0x1e0] sm:$0xff] }
 0x10b   : > { %1018 = vmatpush1.msra.mxu1 %v876_v6  ;;  %1194 = vmatprep.subr.mxu0 %v1113_v56  ;;  %v1165_v6 = vld [vmem:[%s3227_s11 + $0x1d8] sm:$0xff] }
 0x10c   : > { %1019 = vmatprep.subr.mxu1 %v872_v12  ;;  %1195 = vmatpush1.msra.mxu0 %v1112_v58  ;;  %v1163_v12 = vld [vmem:[%s3227_s11 + $0x1c8] sm:$0xff] }
 0x10d   : > { %1020 = vmatpush1.msra.mxu1 %v870_v16  ;;  %1196 = vmatprep.subr.mxu0 %v1111_v59  ;;  %v1161_v16 = vld [vmem:[%s3227_s11 + $0x1b8] sm:$0xff] }
 0x10e   : > { %1021 = vmatprep.subr.mxu1 %v866_v21  ;;  %1197 = vmatpush1.msra.mxu0 %v1110_v60  ;;  %v1158_v21 = vld [vmem:[%s3227_s11 + $0x1a0] sm:$0xff] }
 0x10f   : > { %1022 = vmatpush1.msra.mxu1 %v864_v22  ;;  %1198 = vmatprep.subr.mxu0 %v1109_v61  ;;  %v1157_v22 = vld [vmem:[%s3227_s11 + $0x198] sm:$0xff] }
 0x110   : > { %1023 = vmatprep.subr.mxu1 %v860_v23  ;;  %1199 = vmatpush1.msra.mxu0 %v1108_v62  ;;  %v1156_v23 = vld [vmem:[%s3227_s11 + $0x190] sm:$0xff] }
 0x111   : > { %1024 = vmatpush1.msra.mxu1 %v858_v25  ;;  %1200 = vmatprep.subr.mxu0 %v1107_v63 }
 0x112   : > { %2352 = vmatmul.mubr.msk.f32.vlgmr.msra.gmra.mxu1 %vm989_vm2, %v988_v24  ;;  %1305 = vmatprep.subr.mxu1 %v2608_v8  ;;  %v1242_v8 = vld [vmem:[%s3223_s7 + $0x8] sm:$0xff]  ;;  %vm1968_vm2 = vcmp.eq.s32.totalorder %v2701_v57, 5 }
 0x113   : > { %1306 = vmatpush1.msra.mxu1 %v2611_v9  ;;  %1345 = vmatprep.mubr.f32.mxu1 %v2440_v0  ;;  %v1243_v9 = vld [vmem:[%s3223_s7 + $0x10] sm:$0xff] }
 0x114   : > { %1307 = vmatprep.subr.mxu1 %v2614_v10  ;;  %v1244_v10 = vld [vmem:[%s3223_s7 + $0x18] sm:$0xff]  ;;  %1201 = vmatpush1.msra.mxu0 %v1106_v1 }
 0x115   : > { %1308 = vmatpush1.msra.mxu1 %v2619_v11  ;;  %1202 = vmatprep.subr.mxu0 %v1169_v2 }
 0x116   : > { %1309 = vmatprep.subr.mxu1 %v2623_v13  ;;  %1203 = vmatpush2.msra.mxu0 %v1168_v3 }
 0x117   : > { %1310 = vmatpush1.msra.mxu1 %v2631_v15  ;;  %1204 = vmatprep.subr.mxu0 %v1167_v4 }
 0x118   : > { %1311 = vmatprep.subr.mxu1 %v2638_v17  ;;  %1205 = vmatpush2.msra.mxu0 %v1166_v5 }
 0x119   : > { %1312 = vmatpush1.msra.mxu1 %v2643_v18  ;;  %1206 = vmatprep.subr.mxu0 %v1165_v6 }
 0x11a   : > { %2353 = vmatmul.mubr.msk.f32.vlgmr.msra.gmra.mxu1 %vm766_vm1, %v1241_v26  ;;  %1207 = vmatpush2.msra.mxu0 %v1164_v7 }
 0x11b   : > { %1351 = vmatprep.mubr.f32.mxu1 %v2440_v0  ;;  %1208 = vmatprep.subr.mxu0 %v1163_v12 }
 0x11c   : > { %1209 = vmatpush2.msra.mxu0 %v1162_v14  ;;  %v1370_v14 = vld [vmem:[%s3225_s9] sm:$0xff] }
 0x11d   : > { %1210 = vmatprep.subr.mxu0 %v1161_v16  ;;  %v1373_v16 = vld [vmem:[%s3225_s9 + $0x18] sm:$0xff] }
 0x11e   : > { %2354 = vmatmul.mubr.msk.f32.gmra.mxu1 %vm766_vm1, %v1242_v8  ;;  %1211 = vmatpush2.msra.mxu0 %v1160_v19 }
 0x11f   : > { %1357 = vmatprep.mubr.f32.mxu1 %v2440_v0  ;;  %1212 = vmatprep.subr.mxu0 %v1159_v20 }
 0x120   : > { %1213 = vmatpush2.msra.mxu0 %v1158_v21 }
 0x121   : > { %1214 = vmatprep.subr.mxu0 %v1157_v22 }
 0x122   : > { %2355 = vmatmul.mubr.msk.f32.gmra.mxu1 %vm766_vm1, %v1243_v9  ;;  %1215 = vmatpush2.msra.mxu0 %v1156_v23 }
 0x123   : > { %1363 = vmatprep.mubr.f32.mxu1 %v2440_v0 }
 0x126   : > { %2356 = vmatmul.mubr.msk.f32.gmra.mxu1 %vm766_vm1, %v1244_v10 }
 0x127   : > { %1457 = vmatprep.mubr.f32.mxu1 %v2440_v0 }
 0x1d2   : > { %v1059_v11 = vpop.f32.mrf.mxu1 }
 0x1d3   : > { %v2739_v13 = vmul.f32 0.25, %v1059_v11 }
 0x1d4   : > { %v1061_v15 = vpop.f32.mrf.mxu1 }
 0x1d5   : > { %v2741_v17 = vmul.f32 0.25, %v1061_v15  ;;  %v1067_v18 = vsel %vm1066_vm3, %v2739_v13, -inf  ;;  %v1086_v48 = vand.u32 2147483647, %v2739_v13  ;;  %vm1098_vm5 = vcmp.ge.f32.partialorder %v2739_v13, 0.0 }
 0x1d7   : > { %v1068_v27 = vsel %vm1066_vm3, %v2741_v17, -inf  ;;  %v1087_v49 = vand.u32 2147483647, %v2741_v17  ;;  %v1088_v50 = vsub.f32 0.0, %v1086_v48  ;;  %vm1099_vm6 = vcmp.ge.f32.partialorder %v2741_v17, 0.0 }
 0x1d8   : > { %v1069_v28 = vmax.f32 %v1067_v18, %v1068_v27 }
 0x1d9   : > { %v1089_v52 = vsub.f32 0.0, %v1087_v49  ;;  %v1090_v53 = vmul.f32 1.442695, %v1088_v50 }
 0x1da   : > { %1070 = vmax.xlane.f32.xlu0 %v1069_v28  ;;  %v1155_v28 = vld [vmem:[%s3227_s11 + $0x188] sm:$0xff]  ;;  %v1347_v19 = vpop.f32.mrf.mxu1 }
 0x1db   : > { %1216 = vmatprep.subr.mxu0 %v1155_v28  ;;  %v1092_v54 = vmul.f32 1.442695, %v1089_v52  ;;  %v1503_v28 = vld [vmem:[%s3226_s10 + $0x8] sm:$0xff] }
 0x1dc   : > { %v1349_v20 = vpop.f32.mrf.mxu1 }
 0x1de   : > { %v1353_v21 = vpop.f32.mrf.mxu1 }
 0x1e0   : > { %v1355_v22 = vpop.f32.mrf.mxu1 }
 0x1e2   : > { %v1359_v23 = vpop.f32.mrf.mxu1 }
 0x1f0   : > { %1266 = vperm.xlu0 %2416, %v1248_v29   ;;  %v1154_v29 = vld [vmem:[%s3227_s11 + $0x180] sm:$0xff] }
 0x1f1   : > { %1217 = vmatpush2.msra.mxu0 %v1154_v29 }
 0x1f4   : > { %1256 = vperm.xlu0 %2416, %v1246_v30   ;;  %v1153_v30 = vld [vmem:[%s3227_s11 + $0x178] sm:$0xff] }
 0x1f5   : > { %1218 = vmatprep.subr.mxu0 %v1153_v30 }
 0x1f6   : > { %1219 = vmatpush2.msra.mxu0 %v1152_v31 }
 0x1f7   : > { %1220 = vmatprep.subr.mxu0 %v1151_v33 }
 0x1f8   : > { %1221 = vmatpush2.msra.mxu0 %v1150_v34  ;;  %v1504_v34 = vld [vmem:[%s3226_s10 + $0x10] sm:$0xff] }
 0x1f9   : > { %1222 = vmatprep.subr.mxu0 %v1149_v35 }
 0x1fa   : > { %1223 = vmatpush2.msra.mxu0 %v1148_v36 }
 0x1fb   : > { %1224 = vmatprep.subr.mxu0 %v1147_v38 }
 0x1fc   : > { %1225 = vmatpush2.msra.mxu0 %v1146_v39 }
 0x1fd   : > { %1226 = vmatprep.subr.mxu0 %v1145_v40 }
 0x1fe   : > { %1227 = vmatpush2.msra.mxu0 %v1144_v41 }
 0x1ff   : > { %1228 = vmatprep.subr.mxu0 %v1143_v42 }
 0x200   : > { %1229 = vmatpush2.msra.mxu0 %v1142_v43  ;;  %v1505_v43 = vld [vmem:[%s3226_s10 + $0x18] sm:$0xff] }
 0x201   : > { %1230 = vmatprep.subr.mxu0 %v1141_v44 }
 0x202   : > { %1231 = vmatpush2.msra.mxu0 %v1140_v45 }
 0x203   : > { %1232 = vmatprep.subr.mxu0 %v1139_v46 }
 0x204   : > { %1233 = vmatpush2.msra.mxu0 %v1138_v47 }
 0x263   : > { %v1071_v24 = vpop.xlane.xlu0 %1070 }
 0x264   : > { %v1072_v25 = vsub.f32 %v2739_v13, %v1071_v24  ;;  %v1073_v26 = vsub.f32 %v2741_v17, %v1071_v24  ;;  %v1371_v13 = vld [vmem:[%s3225_s9 + $0x8] sm:$0xff]  ;;  %v1372_v17 = vld [vmem:[%s3225_s9 + $0x10] sm:$0xff]  ;;  %v1361_v24 = vpop.f32.mrf.mxu1 }
 0x266   : > { %v1074_v8 = vmul.f32 1.442695, %v1072_v25  ;;  %v1076_v9 = vmul.f32 1.442695, %v1073_v26  ;;  %v1365_v25 = vpop.f32.mrf.mxu1 }
 0x268   : > { %2418 = vpow2.f32 %v1074_v8  ;;  %v1367_v26 = vpop.f32.mrf.mxu1 }
 0x269   : > { %2420 = vpow2.f32 %v1076_v9 }
 0x26a   : > { %2422 = vpow2.f32 %v1090_v53 }
 0x26b   : > { %2424 = vpow2.f32 %v1092_v54 }
 0x275   : > { %v2893_v10 = vpop.eup %2418 }
 0x276   : > { %v2895_v11 = vpop.eup %2420  ;;  %v1078_v15 = vsel %vm1066_vm3, %v2893_v10, 0.0 }
 0x277   : > { %v1079_v18 = vsel %vm1066_vm3, %v2895_v11, 0.0  ;;  %v2423_v55 = vpop.eup %2422 }
 0x278   : > { %v1080_v27 = vadd.f32 %v1079_v18, %v1078_v15  ;;  %v2425_v56 = vpop.eup %2424  ;;  %v1094_v58 = vadd.f32 1.0, %v2423_v55 }
 0x279   : > { %v1095_v59 = vadd.f32 1.0, %v2425_v56 }
 0x27a   : > { %1081 = vadd.xlane.f32.xlu1 %v1080_v27  ;;  %2426 = vrcp.f32 %v1094_v58  ;;  %v1267_v27 = vpop.permute.xlu0 %1266 }
 0x27b   : > { %2428 = vrcp.f32 %v1095_v59  ;;  %v1366_v40 = vadd.f32 %v1365_v25, %v1267_v27  ;;  %v1368_v41 = vadd.f32 %v1367_v26, %v1267_v27  ;;  %v1759_v27 = vld [vmem:[%s3230_s14 + $0x8] sm:$0x1] }
 0x27e   : > { %v1257_v38 = vpop.permute.xlu0 %1256 }
 0x27f   : > { %v1356_v45 = vadd.f32 %v1355_v22, %v1257_v38  ;;  %v1354_v49 = vadd.f32 %v1353_v21, %v1257_v38 }
 0x287   : > { %v2427_v61 = vpop.eup %2426 }
 0x288   : > { %v2429_v62 = vpop.eup %2428  ;;  %v1100_v1 = vsub.f32 1.0, %v2427_v61 }
 0x289   : > { %v1101_v63 = vsub.f32 1.0, %v2429_v62 }
 0x28a   : > { %v1102_v6 = vsel %vm1098_vm5, %v2427_v61, %v1100_v1  ;;  %v1760_v61 = vld [vmem:[%s3231_s15] sm:$0xff]  ;;  %v1761_v1 = vld [vmem:[%s3231_s15 + $0x8] sm:$0x1] }
 0x28b   : > { %1261 = vperm.xlu1 %2417, %v1247_v32   ;;  %v1103_v5 = vsel %vm1099_vm6, %v2429_v62, %v1101_v63  ;;  %v1626_v62 = vld [vmem:[%s3229_s13 + $0x8] sm:$0xff]  ;;  %v1628_v63 = vld [vmem:[%s3229_s13 + $0x18] sm:$0xff]  ;;  %vm2014_vm6 = vcmp.eq.s32.totalorder %v2701_v57, 7 }
 0x28f   : > { %1251 = vperm.xlu1 %2417, %v1245_v37  }
 0x303   : > { %v1082_v60 = vpop.xlane.xlu1 %1081 }
 0x304   : > { %2430 = vrcp.f32 %v1082_v60 }
 0x307   : > { %v1262_v29 = vpop.permute.xlu1 %1261 }
 0x308   : > { %v1360_v32 = vadd.f32 %v1359_v23, %v1262_v29  ;;  %v1362_v33 = vadd.f32 %v1361_v24, %v1262_v29  ;;  %v1624_v29 = vld [vmem:[%s3228_s12 + $0x18] sm:$0xff] }
 0x30b   : > { %v1252_v48 = vpop.permute.xlu1 %1251 }
 0x30c   : > { %v1350_v53 = vadd.f32 %v1349_v20, %v1252_v48  ;;  %v1348_v55 = vadd.f32 %v1347_v19, %v1252_v48 }
 0x311   : > { %v2431_v2 = vpop.eup %2430 }
 0x312   : > { %v1085_v3 = vmul.f32 %v2431_v2, %v2895_v11  ;;  %v1084_v4 = vmul.f32 %v2431_v2, %v2893_v10  ;;  %v1502_v11 = vld [vmem:[%s3226_s10] sm:$0xff] }
 0x313   : > { %v1625_v2 = vld [vmem:[%s3229_s13] sm:$0xff] }
 0x314   : > { %v1105_v7 = vsel %vm696_vm4, %v1085_v3, %v1103_v5  ;;  %v1104_v12 = vsel %vm696_vm4, %v1084_v4, %v1102_v6  ;;  %v1627_v3 = vld [vmem:[%s3229_s13 + $0x10] sm:$0xff]  ;;  %vm1991_vm4 = vcmp.eq.s32.totalorder %v2701_v57, 6 }
 0x315   : > { %1234 = vmatprep.mubr.f32.mxu0 %v1105_v7  ;;  %2357 = vmatprep.subr.msk.mxu1 %vm1066_vm3, %v1105_v7 }
 0x316   : > { %1235 = vmatmul.mubr.f32.vlgmr.msra.gmra.mxu0 %v1104_v12  ;;  %2358 = vmatpush1.msk.msra.mxu1 %vm1066_vm3, %v1104_v12 }
 0x317   : > { %2359 = vmatmul.mubr.msk.f32.vlgmr.msra.gmra.mxu1 %vm1374_vm7, %v1370_v14  ;;  %1725 = vmatprep.mubr.f32.mxu0 %v2440_v0 }
 0x318   : > { %1463 = vmatprep.mubr.f32.mxu1 %v2440_v0 }
 0x31b   : > { %2360 = vmatmul.mubr.msk.f32.gmra.mxu1 %vm1374_vm7, %v1371_v13 }
 0x31c   : > { %1469 = vmatprep.mubr.f32.mxu1 %v2440_v0 }
 0x31f   : > { %2361 = vmatmul.mubr.msk.f32.gmra.mxu1 %vm1374_vm7, %v1372_v17 }
 0x320   : > { %1475 = vmatprep.mubr.f32.mxu1 %v2440_v0 }
 0x323   : > { %2362 = vmatmul.mubr.msk.f32.gmra.mxu1 %vm1374_vm7, %v1373_v16 }
 0x324   : > { %1588 = vmatprep.mubr.f32.mxu1 %v2440_v0 }
 0x3d6   : > { %v1236_v8 = vpop.f32.mrf.mxu0 }
 0x3d7   : > { %v1459_v9 = vpop.f32.mrf.mxu1 }
 0x3d8   : > { %v1238_v10 = vpop.f32.mrf.mxu0  ;;  %v1482_v59 = vmul.f32 %v1459_v9, %v1348_v55 }
 0x3d9   : > { %v1461_v15 = vpop.f32.mrf.mxu1  ;;  %2363 = vmatprep.subr.msk.mxu1 %vm1066_vm3, %v1238_v10 }
 0x3da   : > { %2364 = vmatpush1.msk.msra.mxu1 %vm1066_vm3, %v1236_v8  ;;  %v1483_v56 = vmul.f32 %v1461_v15, %v1350_v53  ;;  %v1758_v15 = vld [vmem:[%s3230_s14] sm:$0xff] }
 0x3db   : > { %v1465_v18 = vpop.f32.mrf.mxu1  ;;  %2365 = vmatmul.mubr.msk.f32.vlgmr.msra.gmra.mxu1 %vm1374_vm7, %v1502_v11  ;;  %v1621_v11 = vld [vmem:[%s3228_s12] sm:$0xff] }
 0x3dc   : > { %1594 = vmatprep.mubr.f32.mxu1 %v2440_v0  ;;  %v1484_v54 = vmul.f32 %v1465_v18, %v1354_v49  ;;  %v1490_v60 = vadd.f32 %v1483_v56, %v1482_v59  ;;  %v1622_v18 = vld [vmem:[%s3228_s12 + $0x8] sm:$0xff]  ;;  %v2091_v59 = vld [vmem:[%s3233_s17] sm:$0xff] }
 0x3dd   : > { %v1467_v30 = vpop.f32.mrf.mxu1 }
 0x3de   : > { %v1485_v50 = vmul.f32 %v1467_v30, %v1356_v45 }
 0x3df   : > { %v1471_v31 = vpop.f32.mrf.mxu1  ;;  %2366 = vmatmul.mubr.msk.f32.gmra.mxu1 %vm1374_vm7, %v1503_v28  ;;  %v1623_v28 = vld [vmem:[%s3228_s12 + $0x10] sm:$0xff] }
 0x3e0   : > { %1600 = vmatprep.mubr.f32.mxu1 %v2440_v0  ;;  %v1486_v36 = vmul.f32 %v1471_v31, %v1360_v32  ;;  %v1493_v58 = vadd.f32 %v1485_v50, %v1484_v54 }
 0x3e1   : > { %v1473_v35 = vpop.f32.mrf.mxu1 }
 0x3e2   : > { %v1487_v37 = vmul.f32 %v1473_v35, %v1362_v33 }
 0x3e3   : > { %v1477_v39 = vpop.f32.mrf.mxu1  ;;  %2367 = vmatmul.mubr.msk.f32.gmra.mxu1 %vm1374_vm7, %v1504_v34 }
 0x3e4   : > { %1606 = vmatprep.mubr.f32.mxu1 %v2440_v0  ;;  %v1496_v42 = vadd.f32 %v1487_v37, %v1486_v36  ;;  %v1488_v46 = vmul.f32 %v1477_v39, %v1366_v40 }
 0x3e5   : > { %v1479_v44 = vpop.f32.mrf.mxu1 }
 0x3e6   : > { %v1489_v47 = vmul.f32 %v1479_v44, %v1368_v41  ;;  %1497 = vadd.xlane.f32.xlu1 %v1496_v42 }
 0x3e7   : > { %2368 = vmatmul.mubr.msk.f32.gmra.mxu1 %vm1374_vm7, %v1505_v43 }
 0x3e8   : > { %v1499_v52 = vadd.f32 %v1489_v47, %v1488_v46  ;;  %1842 = vmatprep.mubr.f32.mxu1 %v2440_v0 }
 0x3ea   : > { %1500 = vadd.xlane.f32.xlu0 %v1499_v52 }
 0x3ee   : > { %1494 = vadd.xlane.f32.xlu0 %v1493_v58 }
 0x3f2   : > { %1491 = vadd.xlane.f32.xlu0 %v1490_v60 }
 0x3f7   : > { %1764 = vperm.xlu1 %2417, %v1760_v61   ;;  %v2093_v61 = vld [vmem:[%s3233_s17 + $0x10] sm:$0xff] }
 0x3fb   : > { %1636 = vperm.xlu1 %2417, %v1626_v62  }
 0x3ff   : > { %1646 = vperm.xlu1 %2417, %v1628_v63   ;;  %v2092_v63 = vld [vmem:[%s3233_s17 + $0x8] sm:$0xff] }
 0x408   : > { %1769 = vperm.xlu0 %2416, %v1761_v1   ;;  %v2123_v1 = vld [vmem:[%s3234_s18] sm:$0xff] }
 0x40c   : > { %1631 = vperm.xlu0 %2416, %v1625_v2   ;;  %v2094_v2 = vld [vmem:[%s3233_s17 + $0x18] sm:$0xff] }
 0x410   : > { %1641 = vperm.xlu0 %2416, %v1627_v3   ;;  %v2125_v3 = vld [vmem:[%s3234_s18 + $0x10] sm:$0xff] }
 0x46f   : > { %v1498_v21 = vpop.xlane.xlu1 %1497 }
 0x473   : > { %v1501_v12 = vpop.xlane.xlu0 %1500  ;;  %v1765_v31 = vpop.permute.xlu1 %1764 }
 0x477   : > { %v1495_v16 = vpop.xlane.xlu0 %1494  ;;  %v1637_v39 = vpop.permute.xlu1 %1636 }
 0x47b   : > { %v1492_v26 = vpop.xlane.xlu0 %1491  ;;  %v1647_v50 = vpop.permute.xlu1 %1646 }
 0x483   : > { %v3059_v30 = vpop.permute.xlu0 %1769 }
 0x487   : > { %v1632_v32 = vpop.permute.xlu0 %1631 }
 0x48b   : > { %v1642_v45 = vpop.permute.xlu0 %1641 }
 0x49b   : > { %v1590_v4 = vpop.f32.mrf.mxu1 }
 0x49c   : > { %v1613_v10 = vmul.f32 %v1590_v4, %v1492_v26  ;;  %v2124_v4 = vld [vmem:[%s3234_s18 + $0x8] sm:$0xff] }
 0x49d   : > { %v1592_v5 = vpop.f32.mrf.mxu1 }
 0x49e   : > { %v1614_v9 = vmul.f32 %v1592_v5, %v1492_v26  ;;  %v2126_v5 = vld [vmem:[%s3234_s18 + $0x18] sm:$0xff] }
 0x49f   : > { %v1596_v6 = vpop.f32.mrf.mxu1 }
 0x4a0   : > { %v1615_v8 = vmul.f32 %v1596_v6, %v1495_v16 }
 0x4a1   : > { %v1598_v7 = vpop.f32.mrf.mxu1 }
 0x4a2   : > { %v1616_v25 = vmul.f32 %v1598_v7, %v1495_v16 }
 0x4a3   : > { %v1602_v14 = vpop.f32.mrf.mxu1 }
 0x4a4   : > { %v1617_v24 = vmul.f32 %v1602_v14, %v1498_v21 }
 0x4a5   : > { %v1604_v13 = vpop.f32.mrf.mxu1 }
 0x4a6   : > { %v1618_v23 = vmul.f32 %v1604_v13, %v1498_v21  ;;  %v3144_v13 = vand.u32 127, %v694_v51 }
 0x4a7   : > { %v1608_v17 = vpop.f32.mrf.mxu1 }
 0x4a8   : > { %v1619_v22 = vmul.f32 %v1608_v17, %v1501_v12  ;;  %vm1884_vm8 = vcmp.lt.s32.totalorder %v3144_v13, 16  ;;  %vm1865_vm9 = vcmp.lt.s32.totalorder %v3144_v13, 17  ;;  %vm1907_vm11 = vcmp.lt.s32.totalorder %v3144_v13, 15 }
 0x4a9   : > { %v1610_v19 = vpop.f32.mrf.mxu1  ;;  %vm1930_vm14 = vcmp.lt.s32.totalorder %v3144_v13, 1  ;;  %vm1963_vm0 = vcmp.lt.s32.totalorder %v3144_v13, 127  ;;  %vm1986_vm3 = vcmp.lt.s32.totalorder %v3144_v13, 113  ;;  %vm2009_vm5 = vcmp.lt.s32.totalorder %v3144_v13, 112 }
 0x4aa   : > { %v1620_v20 = vmul.f32 %v1610_v19, %v1501_v12  ;;  %vm2032_vm7 = vcmp.lt.s32.totalorder %v3144_v13, 111  ;;  %v698_v13 = vld [vmem:[%s3232_s16] sm:$0xff] }
 0x4ac   : > { %1685 = vmatprep.subr.mxu0 %v1620_v20  ;;  %1802 = vmatprep.subr.mxu1 %v1620_v20 }
 0x4ad   : > { %1686 = vmatpush1.msra.mxu0 %v1619_v22  ;;  %1803 = vmatpush1.msra.mxu1 %v1619_v22 }
 0x4ae   : > { %1687 = vmatprep.subr.mxu0 %v1618_v23  ;;  %1804 = vmatprep.subr.mxu1 %v1618_v23 }
 0x4af   : > { %1688 = vmatpush1.msra.mxu0 %v1617_v24  ;;  %1805 = vmatpush1.msra.mxu1 %v1617_v24 }
 0x4b0   : > { %1689 = vmatprep.subr.mxu0 %v1616_v25  ;;  %1806 = vmatprep.subr.mxu1 %v1616_v25 }
 0x4b1   : > { %1690 = vmatpush1.msra.mxu0 %v1615_v8  ;;  %1807 = vmatpush1.msra.mxu1 %v1615_v8 }
 0x4b2   : > { %1691 = vmatprep.subr.mxu0 %v1614_v9  ;;  %1808 = vmatprep.subr.mxu1 %v1614_v9 }
 0x4b3   : > { %1692 = vmatpush1.msra.mxu0 %v1613_v10  ;;  %1809 = vmatpush1.msra.mxu1 %v1613_v10 }
 0x4b4   : > { %2369 = vmatmul.mubr.msk.f32.vlgmr.msra.gmra.mxu0 %vm766_vm1, %v1621_v11  ;;  %2373 = vmatmul.mubr.msk.f32.vlgmr.msra.gmra.mxu1 %vm766_vm1, %v1758_v15 }
 0x4b5   : > { %1731 = vmatprep.mubr.f32.mxu0 %v2440_v0  ;;  %1848 = vmatprep.mubr.f32.mxu1 %v2440_v0 }
 0x4b8   : > { %2370 = vmatmul.mubr.msk.f32.gmra.mxu0 %vm766_vm1, %v1622_v18  ;;  %2374 = vmatmul.mubr.msk.f32.gmra.mxu1 %vm766_vm1, %v1759_v27 }
 0x4b9   : > { %1737 = vmatprep.mubr.f32.mxu0 %v2440_v0 }
 0x4bc   : > { %2371 = vmatmul.mubr.msk.f32.gmra.mxu0 %vm766_vm1, %v1623_v28 }
 0x4bd   : > { %1743 = vmatprep.mubr.f32.mxu0 %v2440_v0 }
 0x4c0   : > { %2372 = vmatmul.mubr.msk.f32.gmra.mxu0 %vm766_vm1, %v1624_v29  ;;  %vm1945_vm1 = vcmp.eq.s32.totalorder %v2701_v57, 4 }
 0x574   : > { %v1727_v33 = vpop.f32.mrf.mxu0  ;;  %v1844_v34 = vpop.f32.mrf.mxu1 }
 0x575   : > { %v3067_v0 = vadd.f32 %v1727_v33, %v1632_v32  ;;  %v3069_v35 = vadd.f32 %v1844_v34, %v1765_v31 }
 0x576   : > { %v1729_v36 = vpop.f32.mrf.mxu0  ;;  %v1846_v37 = vpop.f32.mrf.mxu1 }
 0x577   : > { %1750 = vst [vmem:[%s3065_s23] sm:$0xff] %v3067_v0  ;;  %v3073_v38 = vadd.f32 %v1729_v36, %v1632_v32  ;;  %1876 = vrot.lane.b32.xlu0 %v3069_v35, %s2443_s1  ;;  %1855 = vrot.lane.b32.xlu1 %v3069_v35, %s2444_s26  ;;  %v3079_v41 = vadd.f32 %v1846_v37, %v1765_v31 }
 0x578   : > { %v1733_v40 = vpop.f32.mrf.mxu0  ;;  %v1850_v56 = vpop.f32.mrf.mxu1 }
 0x579   : > { %1751 = vst [vmem:[%s3065_s23 + $0x8] sm:$0xff] %v3073_v38  ;;  %v3081_v42 = vadd.f32 %v1733_v40, %v1637_v39  ;;  %v1851_v58 = vadd.f32 %v1850_v56, %v3059_v30 }
 0x57a   : > { %v1735_v43 = vpop.f32.mrf.mxu0  ;;  %v1852_v60 = vpop.f32.mrf.mxu1 }
 0x57b   : > { %1752 = vst [vmem:[%s3065_s23 + $0x10] sm:$0xff] %v3081_v42  ;;  %v3085_v44 = vadd.f32 %v1735_v43, %v1637_v39  ;;  %1899 = vrot.lane.b32.xlu0 %v3069_v35, %s2445_s27  ;;  %1859 = vrot.lane.b32.xlu1 %v3079_v41, %s2444_s26  ;;  %v1853_v62 = vadd.f32 %v1852_v60, %v3059_v30  ;;  %s3257_s26 = sld [smem:[#allocation10_spill]] }
 0x57c   : > { %v1739_v46 = vpop.f32.mrf.mxu0 }
 0x57d   : > { %1753 = vst [vmem:[%s3065_s23 + $0x18] sm:$0xff] %v3085_v44  ;;  %v3091_v47 = vadd.f32 %v1739_v46, %v1642_v45 }
 0x57e   : > { %v1741_v48 = vpop.f32.mrf.mxu0 }
 0x57f   : > { %1754 = vst [vmem:[%s3065_s23 + $0x20] sm:$0xff] %v3091_v47  ;;  %v3095_v49 = vadd.f32 %v1741_v48, %v1642_v45  ;;  %1922 = vrot.lane.b32.xlu0 %v3069_v35, %s2446_s28  ;;  %1880 = vrot.lane.b32.xlu1 %v3079_v41, %s2443_s1  ;;  %v1948_v48 = vsel %vm1945_vm1, %v3079_v41, 0.0  ;;  %s2340_s1 = sshll.u32 %s3260_s25, 1 }
 0x580   : > { %v1745_v52 = vpop.f32.mrf.mxu0 }
 0x581   : > { %1755 = vst [vmem:[%s3065_s23 + $0x28] sm:$0xff] %v3095_v49  ;;  %v3101_v53 = vadd.f32 %v1745_v52, %v1647_v50 }
 0x582   : > { %v1747_v54 = vpop.f32.mrf.mxu0 }
 0x583   : > { %1756 = vst [vmem:[%s3065_s23 + $0x30] sm:$0xff] %v3101_v53  ;;  %v3105_v55 = vadd.f32 %v1747_v54, %v1647_v50  ;;  %1955 = vrot.lane.b32.xlu0 %v3069_v35, %s2447_s29  ;;  %1903 = vrot.lane.b32.xlu1 %v3079_v41, %s2445_s27  ;;  %v1947_v50 = vsel %vm1945_vm1, %v3069_v35, 0.0  ;;  %s688_s27 = scalar_lea.vmem %s3257_s26, %s2340_s1 }
 0x585   : > { %1757 = vst [vmem:[%s3065_s23 + $0x38] sm:$0xff] %v3105_v55  ;;  %s3190_s23 = scalar_lea.vmem %s3256_s22, %s2582_s0 }
 0x587   : > { %1978 = vrot.lane.b32.xlu0 %v3069_v35, %s2448_s4  ;;  %1926 = vrot.lane.b32.xlu1 %v3079_v41, %s2446_s28 }
 0x58b   : > { %2001 = vrot.lane.b32.xlu0 %v3069_v35, %s2449_s30  ;;  %1959 = vrot.lane.b32.xlu1 %v3079_v41, %s2447_s29 }
 0x58f   : > { %1982 = vrot.lane.b32.xlu1 %v3079_v41, %s2448_s4  ;;  %2026 = vrot.lane.b32.xlu0 %v1851_v58, %s2450_s20 }
 0x593   : > { %2005 = vrot.lane.b32.xlu1 %v3079_v41, %s2449_s30  ;;  %2097 = vperm.xlu0 %2416, %v2091_v59   ;;  %v697_v41 = vadd.s32 8, %v2701_v57 }
 0x597   : > { %2030 = vrot.lane.b32.xlu1 %v1853_v62, %s2450_s20  ;;  %2107 = vperm.xlu0 %2416, %v2093_v61  }
 0x59b   : > { %2102 = vperm.xlu1 %2417, %v2092_v63   ;;  %2129 = vperm.xlu0 %2416, %v2123_v1  }
 0x59f   : > { %2112 = vperm.xlu1 %2417, %v2094_v2   ;;  %2139 = vperm.xlu0 %2416, %v2125_v3  }
 0x5a3   : > { %2134 = vperm.xlu1 %2417, %v2124_v4  }
 0x5a7   : > { %2144 = vperm.xlu1 %2417, %v2126_v5  }
 0x5e9   : > { %v1856_v6 = vpop.permute.xlu1 %1855  ;;  %v1877_v7 = vpop.permute.xlu0 %1876 }
 0x5ed   : > { %v1860_v12 = vpop.permute.xlu1 %1859  ;;  %v1900_v14 = vpop.permute.xlu0 %1899 }
 0x5ee   : > { %v1866_v21 = vsel %vm1865_vm9, %v1856_v6, %v1860_v12  ;;  %v1868_v22 = vsel %vm1865_vm9, %v1860_v12, %v1856_v6  ;;  %vm2051_vm9 = vcmask 1040384  }
 0x5ef   : > { %v1872_v10 = vsel %vm1870_vm12, %v1868_v22, 0.0  ;;  %v1873_v11 = vsel %vm1870_vm12, %v1866_v21, 0.0  ;;  %v701_v21 = vld [vmem:[%s3232_s16 + $0x18] sm:$0x1]  ;;  %vm2088_vm12 = vcmp.lt.s32.totalorder %v694_v51, 256 }
 0x5f1   : > { %v1881_v17 = vpop.permute.xlu1 %1880  ;;  %v1923_v16 = vpop.permute.xlu0 %1922 }
 0x5f2   : > { %v1885_v19 = vsel %vm1884_vm8, %v1877_v7, %v1881_v17  ;;  %v1887_v20 = vsel %vm1884_vm8, %v1881_v17, %v1877_v7  ;;  %vm2038_vm8 = vcmp.eq.s32.totalorder %v697_v41, 8 }
 0x5f3   : > { %v1891_v24 = vsel %vm1889_vm10, %v1887_v20, 0.0  ;;  %v1892_v25 = vsel %vm1889_vm10, %v1885_v19, 0.0  ;;  %v700_v20 = vld [vmem:[%s3232_s16 + $0x10] sm:$0x1] }
 0x5f4   : > { %v1895_v27 = vadd.f32 %v1891_v24, %v1872_v10  ;;  %v1896_v28 = vadd.f32 %v1892_v25, %v1873_v11 }
 0x5f5   : > { %v1904_v23 = vpop.permute.xlu1 %1903  ;;  %v1956_v9 = vpop.permute.xlu0 %1955 }
 0x5f6   : > { %v1908_v26 = vsel %vm1907_vm11, %v1900_v14, %v1904_v23  ;;  %v1910_v8 = vsel %vm1907_vm11, %v1904_v23, %v1900_v14  ;;  %v699_v23 = vld [vmem:[%s3232_s16 + $0x8] sm:$0xff] }
 0x5f7   : > { %v1914_v15 = vsel %vm1912_vm13, %v1910_v8, 0.0  ;;  %v1915_v18 = vsel %vm1912_vm13, %v1908_v26, 0.0 }
 0x5f8   : > { %v1918_v32 = vadd.f32 %v1914_v15, %v1895_v27  ;;  %v1919_v33 = vadd.f32 %v1915_v18, %v1896_v28 }
 0x5f9   : > { %v1927_v29 = vpop.permute.xlu1 %1926  ;;  %v1979_v40 = vpop.permute.xlu0 %1978 }
 0x5fa   : > { %v1931_v30 = vsel %vm1930_vm14, %v1923_v16, %v1927_v29  ;;  %v1933_v31 = vsel %vm1930_vm14, %v1927_v29, %v1923_v16 }
 0x5fb   : > { %v1937_v34 = vsel %vm1935_vm15, %v1933_v31, 0.0  ;;  %v1938_v36 = vsel %vm1935_vm15, %v1931_v30, 0.0 }
 0x5fc   : > { %v1941_v37 = vadd.f32 %v1937_v34, %v1918_v32  ;;  %v1942_v39 = vadd.f32 %v1938_v36, %v1919_v33  ;;  %v2451_v33 = vmov 1966171168  }
 0x5fd   : > { %v1960_v43 = vpop.permute.xlu1 %1959  ;;  %v2002_v62 = vpop.permute.xlu0 %2001  ;;  %v2072_v34 = vunpack.c.l.s4 %v2451_v33 }
 0x5fe   : > { %v1964_v45 = vsel %vm1963_vm0, %v1956_v9, %v1960_v43  ;;  %v1966_v46 = vsel %vm1963_vm0, %v1960_v43, %v1956_v9  ;;  %v1951_v52 = vadd.f32 %v1947_v50, %v1941_v37  ;;  %v1952_v54 = vadd.f32 %v1948_v48, %v1942_v39 }
 0x5ff   : > { %v1970_v58 = vsel %vm1968_vm2, %v1964_v45, 0.0  ;;  %v1971_v59 = vsel %vm1968_vm2, %v1966_v46, 0.0  ;;  %v2073_v45 = vunpack.c.0.s8 %v2072_v34 }
 0x600   : > { %v1974_v2 = vadd.f32 %v1970_v58, %v1951_v52  ;;  %v1975_v35 = vadd.f32 %v1971_v59, %v1952_v54  ;;  %v2155_v58 = vld [vmem:[%s2602_s19] sm:$0xff]  ;;  %v2156_v59 = vld [vmem:[%s2602_s19 + $0x8] sm:$0xff] }
 0x601   : > { %v1983_v56 = vpop.permute.xlu1 %1982  ;;  %v2027_v17 = vpop.permute.xlu0 %2026 }
 0x602   : > { %v1987_v60 = vsel %vm1986_vm3, %v1979_v40, %v1983_v56  ;;  %v1989_v61 = vsel %vm1986_vm3, %v1983_v56, %v1979_v40 }
 0x603   : > { %v1993_v63 = vsel %vm1991_vm4, %v1987_v60, 0.0  ;;  %v1994_v1 = vsel %vm1991_vm4, %v1989_v61, 0.0 }
 0x604   : > { %v1997_v6 = vadd.f32 %v1993_v63, %v1974_v2  ;;  %v1998_v7 = vadd.f32 %v1994_v1, %v1975_v35  ;;  %v2076_v1 = vsub.s32 %v2073_v45, %v2701_v57 }
 0x605   : > { %v2006_v3 = vpop.permute.xlu1 %2005 }
 0x606   : > { %v2010_v4 = vsel %vm2009_vm5, %v2002_v62, %v2006_v3  ;;  %v2012_v5 = vsel %vm2009_vm5, %v2006_v3, %v2002_v62 }
 0x607   : > { %v2016_v12 = vsel %vm2014_vm6, %v2010_v4, 0.0  ;;  %v2017_v14 = vsel %vm2014_vm6, %v2012_v5, 0.0 }
 0x608   : > { %v2020_v16 = vadd.f32 %v2016_v12, %v1997_v6  ;;  %v2021_v19 = vadd.f32 %v2017_v14, %v1998_v7  ;;  %v2159_v6 = vld [vmem:[%s2602_s19 + $0x20] sm:$0xff]  ;;  %v2160_v7 = vld [vmem:[%s2602_s19 + $0x28] sm:$0xff] }
 0x609   : > { %v2031_v22 = vpop.permute.xlu1 %2030 }
 0x60a   : > { %v2034_v24 = vsel %vm2032_vm7, %v2027_v17, %v2031_v22  ;;  %v2036_v25 = vsel %vm2032_vm7, %v2031_v22, %v2027_v17  ;;  %v2047_v11 = vmul.f32 %v2020_v16, %v698_v13  ;;  %v2048_v15 = vmul.f32 %v2021_v19, %v699_v23 }
 0x60b   : > { %v2041_v26 = vsel %vm2038_vm8, %v2034_v24, 0.0  ;;  %v2042_v8 = vsel %vm2038_vm8, %v2036_v25, 0.0  ;;  %v2157_v24 = vld [vmem:[%s2602_s19 + $0x10] sm:$0xff]  ;;  %v2158_v25 = vld [vmem:[%s2602_s19 + $0x18] sm:$0xff] }
 0x60c   : > { %v2049_v9 = vmul.f32 %v2041_v26, %v700_v20  ;;  %v2050_v10 = vmul.f32 %v2042_v8, %v701_v21 }
 0x60e   : > { %v2052_v18 = vsel %vm2051_vm9, %v2049_v9, 0.0  ;;  %v2060_v27 = vsel %vm2051_vm9, %v2050_v10, 0.0  ;;  %v2098_v28 = vpop.permute.xlu0 %2097 }
 0x60f   : > { %v2053_v29 = vadd.f32 %v2052_v18, %v2047_v11  ;;  %v2061_v30 = vadd.f32 %v2060_v27, %v2048_v15  ;;  %v2115_v46 = vmul.f32 %v2098_v28, %v3067_v0  ;;  %v2116_v48 = vmul.f32 %v2098_v28, %v3073_v38  ;;  %v2161_v27 = vld [vmem:[%s2602_s19 + $0x30] sm:$0xff]  ;;  %v2162_v28 = vld [vmem:[%s2602_s19 + $0x38] sm:$0xff] }
 0x611   : > { %v2054_v31 = vrot.slane %v2053_v29, 4  ;;  %v2062_v32 = vrot.slane %v2061_v30, 4 }
 0x612   : > { %v2108_v36 = vpop.permute.xlu0 %2107 }
 0x613   : > { %v2055_v37 = vadd.f32 %v2054_v31, %v2053_v29  ;;  %v2063_v39 = vadd.f32 %v2062_v32, %v2061_v30  ;;  %v2119_v4 = vmul.f32 %v2108_v36, %v3091_v47  ;;  %v2120_v5 = vmul.f32 %v2108_v36, %v3095_v49 }
 0x615   : > { %v2056_v40 = vrot.slane %v2055_v37, 2  ;;  %v2064_v43 = vrot.slane %v2063_v39, 2 }
 0x616   : > { %v2103_v50 = vpop.permute.xlu1 %2102  ;;  %v2130_v52 = vpop.permute.xlu0 %2129 }
 0x617   : > { %v2057_v54 = vadd.f32 %v2056_v40, %v2055_v37  ;;  %v2065_v56 = vadd.f32 %v2064_v43, %v2063_v39  ;;  %v2147_v60 = vadd.f32 %v2130_v52, %v2115_v46  ;;  %v2148_v61 = vadd.f32 %v2130_v52, %v2116_v48 }
 0x618   : > { %v2117_v47 = vmul.f32 %v2103_v50, %v3081_v42  ;;  %v2118_v16 = vmul.f32 %v2103_v50, %v3085_v44 }
 0x619   : > { %v2058_v62 = vrot.slane %v2057_v54, 1  ;;  %v2066_v63 = vrot.slane %v2065_v56, 1  ;;  %v2163_v41 = vadd.f32 %v2155_v58, %v2147_v60  ;;  %v2164_v0 = vadd.f32 %v2156_v59, %v2148_v61 }
 0x61a   : > { %v2113_v2 = vpop.permute.xlu1 %2112  ;;  %v2140_v38 = vpop.permute.xlu0 %2139 }
 0x61b   : > { %v2059_v35 = vadd.f32 %v2058_v62, %v2057_v54  ;;  %v2067_v3 = vadd.f32 %v2066_v63, %v2065_v56  ;;  %vm2171_vm10 = vcmp.ge.f32.partialorder %v2163_v41, 0.0  ;;  %vm2172_vm11 = vcmp.ge.f32.partialorder %v2164_v0, 0.0 }
 0x61c   : > { %v2179_v57 = vmul.f32 0.1, %v2163_v41  ;;  %v2180_v12 = vmul.f32 0.1, %v2164_v0  ;;  %v2151_v49 = vadd.f32 %v2140_v38, %v2119_v4  ;;  %v2152_v17 = vadd.f32 %v2140_v38, %v2120_v5 }
 0x61d   : > { %v2070_v14 = vcombine.low %v2059_v35, %v2067_v3  ;;  %v2121_v42 = vmul.f32 %v2113_v2, %v3101_v53  ;;  %v2122_v44 = vmul.f32 %v2113_v2, %v3105_v55 }
 0x61e   : > { %v2187_v19 = vsel %vm2171_vm10, %v2163_v41, %v2179_v57  ;;  %v2188_v20 = vsel %vm2172_vm11, %v2164_v0, %v2180_v12  ;;  %v2135_v21 = vpop.permute.xlu1 %2134  ;;  %v2167_v13 = vadd.f32 %v2159_v6, %v2151_v49  ;;  %v2168_v23 = vadd.f32 %v2160_v7, %v2152_v17 }
 0x61f   : > { %v2077_v22 = vrot.slane %v2070_v14, %v2076_v1  ;;  %2195 = vst [vmem:[%s3190_s23] sm:$0xff] %v2187_v19  ;;  %2196 = vst [vmem:[%s3190_s23 + $0x8] sm:$0xff] %v2188_v20  ;;  %v2149_v26 = vadd.f32 %v2135_v21, %v2117_v47  ;;  %v2150_v8 = vadd.f32 %v2135_v21, %v2118_v16 }
 0x620   : > { %vm2175_vm13 = vcmp.ge.f32.partialorder %v2167_v13, 0.0  ;;  %vm2176_vm14 = vcmp.ge.f32.partialorder %v2168_v23, 0.0  ;;  %v2183_v10 = vmul.f32 0.1, %v2167_v13  ;;  %v2184_v11 = vmul.f32 0.1, %v2168_v23 }
 0x621   : > { %v2084_v9 = vrot.slane %v2077_v22, %v2076_v1  ;;  %v2165_v15 = vadd.f32 %v2157_v24, %v2149_v26  ;;  %v2166_v18 = vadd.f32 %v2158_v25, %v2150_v8 }
 0x622   : > { %v2145_v29 = vpop.permute.xlu1 %2144  ;;  %v2191_v51 = vsel %vm2175_vm13, %v2167_v13, %v2183_v10  ;;  %v2192_v55 = vsel %vm2176_vm14, %v2168_v23, %v2184_v11 }
 0x623   : > { %2090 = vst.msk [vmem:[%s688_s27] sm:$0x3] %vm2088_vm12, %v2084_v9  ;;  %v2153_v30 = vadd.f32 %v2145_v29, %v2121_v42  ;;  %v2154_v53 = vadd.f32 %v2145_v29, %v2122_v44  ;;  %2199 = vst [vmem:[%s3190_s23 + $0x20] sm:$0xff] %v2191_v51  ;;  %vm2173_vm15 = vcmp.ge.f32.partialorder %v2165_v15, 0.0  ;;  %vm2174_vm0 = vcmp.ge.f32.partialorder %v2166_v18, 0.0 }
 0x624   : > { %v2181_v31 = vmul.f32 0.1, %v2165_v15  ;;  %2200 = vst [vmem:[%s3190_s23 + $0x28] sm:$0xff] %v2192_v55  ;;  %v2182_v32 = vmul.f32 0.1, %v2166_v18 }
 0x625   : > { %v2169_v33 = vadd.f32 %v2161_v27, %v2153_v30  ;;  %v2170_v34 = vadd.f32 %v2162_v28, %v2154_v53 }
 0x626   : > { %v2189_v36 = vsel %vm2173_vm15, %v2165_v15, %v2181_v31  ;;  %v2190_v37 = vsel %vm2174_vm0, %v2166_v18, %v2182_v32 }
 0x627   : > { %2197 = vst [vmem:[%s3190_s23 + $0x10] sm:$0xff] %v2189_v36  ;;  %vm2177_vm1 = vcmp.ge.f32.partialorder %v2169_v33, 0.0  ;;  %vm2178_vm2 = vcmp.ge.f32.partialorder %v2170_v34, 0.0  ;;  %v2185_v39 = vmul.f32 0.1, %v2169_v33  ;;  %2198 = vst [vmem:[%s3190_s23 + $0x18] sm:$0xff] %v2190_v37 }
 0x628   : > { %v2186_v40 = vmul.f32 0.1, %v2170_v34 }
 0x629   : > { %v2193_v43 = vsel %vm2177_vm1, %v2169_v33, %v2185_v39 }
 0x62a   : > { %v2194_v45 = vsel %vm2178_vm2, %v2170_v34, %v2186_v40  ;;  %2201 = vst [vmem:[%s3190_s23 + $0x30] sm:$0xff] %v2193_v43 }
 0x62b   : > { %2202 = vst [vmem:[%s3190_s23 + $0x38] sm:$0xff] %v2194_v45 }
 0x62c PF: > { %s3258_s19 = sld [smem:[#allocation2_spill]] }
 0x632   : > { %s32_s2 = sadd.s32 1, %s3258_s19  }
 0x633   : > { %p29_p4 = scmp.ge.s32.totalorder %s32_s2, 4  }
 0x635   :  { %31 = sbr.rel (!%p29_p4) target bundleno = 9 (0x9), region = 153 }

</bundles_post_ra>
